<compile_context>
chip_gen: v7x
topology: tpu7x:2x2x1
jax: 0.10.0
libtpu: 0.0.40
codegen_flags: <defaults>
</compile_context>

<pallas_src>
import functools

import numpy as np

import jax
import jax.numpy as jnp
from jax.experimental import pallas as pl
from jax.experimental.pallas import tpu as pltpu


def _full_spec(shape):
    """Whole-array block for a grid=(1,) pallas_call."""
    return pl.BlockSpec(shape, lambda i: (0,) * len(shape))


# ----------------------- the single fused kernel ------------------------------

def _fused_forward_kernel(x_ref, ew1_ref, eb1_ref, wmu_ref, bmu_ref,
                          wlv_ref, blv_ref, eps_ref, wd1_ref, bd1_ref,
                          wd2_ref, bd2_ref, wbb_ref, bbb_ref,
                          out_ref, both_ref, *, inv_batch):
    f32 = jnp.float32
    x = x_ref[...]                                                    # (B, D)
    b = x.shape[0]

    # ---- VAE encoder / reparameterize / decoder (all on-chip) ----
    h = jnp.maximum(
        jnp.dot(x, ew1_ref[...], preferred_element_type=f32) + eb1_ref[...], 0.0)
    mu = jnp.dot(h, wmu_ref[...], preferred_element_type=f32) + bmu_ref[...]
    logvar = jnp.dot(h, wlv_ref[...], preferred_element_type=f32) + blv_ref[...]
    std = jnp.exp(0.5 * logvar)                      # exp computed once
    z = mu + std * eps_ref[...]                                      # (B, latent)
    h2 = jnp.maximum(
        jnp.dot(z, wd1_ref[...], preferred_element_type=f32) + bd1_ref[...], 0.0)
    recon = jax.nn.sigmoid(
        jnp.dot(h2, wd2_ref[...], preferred_element_type=f32) + bd2_ref[...])

    # ---- KL divergence ('variat'); exp(logvar) == std * std ----
    kld = -0.5 * jnp.sum(1.0 + logvar - mu * mu - std * std) * inv_batch

    # ---- backbone (conv+BN+ReLU+channel-slice folded into one matmul) on
    #      BOTH the input and the reconstruction: one MXU dot, weight pushed
    #      once.  The two row-halves are staged in a VMEM scratch.
    both_ref[0:b, :] = x
    both_ref[b:2 * b, :] = recon
    y = jnp.maximum(
        jnp.dot(both_ref[...], wbb_ref[...], preferred_element_type=f32)
        + bbb_ref[...], 0.0)                                          # (2B, O)
    d = y[:b, :] - y[b:, :]
    rec_loss = jnp.sum(d * d) * inv_batch

    # ---- pack scalars into one lane-dense row: [variat, recon, loss, 0...] ----
    lane = jax.lax.broadcasted_iota(jnp.int32, out_ref.shape, 1)
    out = jnp.where(lane == 0, kld,
          jnp.where(lane == 1, rec_loss,
          jnp.where(lane == 2, kld + rec_loss, 0.0)))
    out_ref[...] = out.astype(out_ref.dtype)


def fused_forward(x_flat, params, eps):
    """One pallas_call for the full forward.  Returns a (1,128) row with
    [variat, recon_loss, total_loss, 0, ...]."""
    B, D = x_flat.shape
    args = (
        x_flat,
        params["enc_w1"], params["enc_b1"],
        params["mu_w"], params["mu_b"],
        params["lv_w"], params["lv_b"],
        eps,
        params["dec_w1"], params["dec_b1"],
        params["dec_w2"], params["dec_b2"],
        params["bb_w"], params["bb_b"],
    )
    return pl.pallas_call(
        functools.partial(_fused_forward_kernel, inv_batch=1.0 / B),
        out_shape=jax.ShapeDtypeStruct((1, 128), jnp.float32),
        grid=(1,),
        in_specs=[_full_spec(a.shape) for a in args],
        out_specs=_full_spec((1, 128)),
        scratch_shapes=[pltpu.VMEM((2 * B, D), jnp.float32)],
        compiler_params=pltpu.CompilerParams(
            dimension_semantics=("arbitrary",)),
    )(*args)


# ------------------------------ JAX glue --------------------------------------

def inter_bn_autoencoder_forward_train(img, params, eps, image_region=(2, 14)):
    """Mirrors InterBNAutoEncoder.forward(img, mode='train')."""
    _l, _r = image_region
    img_c = img[:, :, _l:_r, _l:_r]               # crop (image_region)
    B = img_c.shape[0]
    x_flat = img_c.reshape(B, -1)                 # NCHW-flat; consumed by kernel
    row = fused_forward(x_flat, params, eps)[0]   # (128,)
    return {"variat": row[0], "recon": row[1], "loss": row[2]}


# ----------------------- host-side backbone folding ---------------------------

def _fold_backbone_to_matmul(p, H, W, inter_channels, eps_bn=1e-5):
    """Fold conv3x3('same') + BN(running stats) + [:, :inter_channels] into a
    dense (C*H*W, inter*H*W) matmul weight and (1, inter*H*W) bias, NCHW-flat
    on both sides.  Host-side numpy, done once at parameter-prep time."""
    conv_w = np.asarray(p["conv_w"], np.float32)           # (Cout, Cin, 3, 3)
    conv_b = np.asarray(p["conv_b"], np.float32)
    scale = np.asarray(p["bn_gamma"], np.float32) / np.sqrt(
        np.asarray(p["bn_var"], np.float32) + eps_bn)
    shift = (conv_b - np.asarray(p["bn_mean"], np.float32)) * scale + \
        np.asarray(p["bn_beta"], np.float32)
    w_fold = (conv_w * scale[:, None, None, None])[:inter_channels]
    b_fold = shift[:inter_channels]                         # (Co,)
    Co, Cin, k, _ = w_fold.shape

    w_big = np.zeros((Cin * H * W, Co * H * W), np.float32)
    hs, ws = np.arange(H), np.arange(W)
    for di in range(k):
        for dj in range(k):
            hi, wi = hs + di - 1, ws + dj - 1
            vh, vw = (hi >= 0) & (hi < H), (wi >= 0) & (wi < W)
            in_sp = (hi[vh][:, None] * W + wi[vw][None, :]).ravel()
            out_sp = (hs[vh][:, None] * W + ws[vw][None, :]).ravel()
            for ci in range(Cin):
                for co in range(Co):
                    w_big[ci * H * W + in_sp, co * H * W + out_sp] = \
                        w_fold[co, ci, di, dj]
    b_big = np.repeat(b_fold, H * W).reshape(1, Co * H * W)
    return jnp.asarray(w_big), jnp.asarray(b_big)


# ------------------------------ params ----------------------------------------

def init_params(key, cin=4, cout=8, hid=32, latent=8, img_hw=12,
                inter_channels=4):
    keys = jax.random.split(key, 6)
    d_in = cin * img_hw * img_hw

    def w(k, shape):
        return jax.random.normal(k, shape, jnp.float32) * 0.05

    params = {
        "conv_w": w(keys[0], (cout, cin, 3, 3)),
        "conv_b": jnp.zeros((cout,), jnp.float32),
        "bn_gamma": jnp.ones((cout,), jnp.float32),
        "bn_beta": jnp.zeros((cout,), jnp.float32),
        "bn_mean": jnp.zeros((cout,), jnp.float32),
        "bn_var": jnp.ones((cout,), jnp.float32),
        "enc_w1": w(keys[1], (d_in, hid)),
        "enc_b1": jnp.zeros((1, hid), jnp.float32),
        "mu_w": w(keys[2], (hid, latent)),
        "mu_b": jnp.zeros((1, latent), jnp.float32),
        "lv_w": w(keys[3], (hid, latent)),
        "lv_b": jnp.zeros((1, latent), jnp.float32),
        "dec_w1": w(keys[4], (latent, hid)),
        "dec_b1": jnp.zeros((1, hid), jnp.float32),
        "dec_w2": w(keys[5], (hid, d_in)),
        "dec_b2": jnp.zeros((1, d_in), jnp.float32),
    }
    bb_w, bb_b = _fold_backbone_to_matmul(params, img_hw, img_hw, inter_channels)
    params["bb_w"] = bb_w
    params["bb_b"] = bb_b
    return params


if __name__ == "__main__":
    key = jax.random.PRNGKey(0)
    k_img, k_eps, k_par = jax.random.split(key, 3)

    img = jax.random.normal(k_img, (2, 4, 16, 16), jnp.float32)   # NCHW input
    image_region = (2, 14)                                        # -> 12x12 crop
    inter_channels = 4
    latent = 8
    hw = image_region[1] - image_region[0]

    params = init_params(k_par, cin=4, cout=8, hid=32, latent=latent,
                         img_hw=hw, inter_channels=inter_channels)
    eps = jax.random.normal(k_eps, (img.shape[0], latent), jnp.float32)

    fwd = jax.jit(functools.partial(inter_bn_autoencoder_forward_train,
                                    image_region=image_region))
    out = fwd(img, params, eps)
    jax.block_until_ready(out)

    assert jnp.isfinite(out["loss"]) and jnp.isfinite(out["variat"]) \
        and jnp.isfinite(out["recon"])
    print("KERNEL_OK")
</pallas_src>

<mosaic_0001>
module attributes {stable_mosaic.version = 11 : i64} {
  func.func @_fused_forward_kernel(%arg0: i32, %arg1: memref<2x576xf32, #tpu.memory_space<vmem>>, %arg2: memref<576x32xf32, #tpu.memory_space<vmem>>, %arg3: memref<1x32xf32, #tpu.memory_space<vmem>>, %arg4: memref<32x8xf32, #tpu.memory_space<vmem>>, %arg5: memref<1x8xf32, #tpu.memory_space<vmem>>, %arg6: memref<32x8xf32, #tpu.memory_space<vmem>>, %arg7: memref<1x8xf32, #tpu.memory_space<vmem>>, %arg8: memref<2x8xf32, #tpu.memory_space<vmem>>, %arg9: memref<8x32xf32, #tpu.memory_space<vmem>>, %arg10: memref<1x32xf32, #tpu.memory_space<vmem>>, %arg11: memref<32x576xf32, #tpu.memory_space<vmem>>, %arg12: memref<1x576xf32, #tpu.memory_space<vmem>>, %arg13: memref<576x576xf32, #tpu.memory_space<vmem>>, %arg14: memref<1x576xf32, #tpu.memory_space<vmem>>, %arg15: memref<1x128xf32, #tpu.memory_space<vmem>>, %arg16: memref<4x576xf32, #tpu.memory_space<vmem>>) attributes {dimension_semantics = [#tpu.dimension_semantics<arbitrary>], iteration_bounds = array<i64: 1>, scalar_prefetch = 0 : i64, scratch_operands = 1 : i64, tpu.core_type = #tpu.core_type<tc>, window_params = [{pipeline_mode = #tpu.pipeline_mode<synchronous>, transform_indices = @transform_0, window_bounds = array<i64: 2, 576>}, {pipeline_mode = #tpu.pipeline_mode<synchronous>, transform_indices = @transform_1, window_bounds = array<i64: 576, 32>}, {pipeline_mode = #tpu.pipeline_mode<synchronous>, transform_indices = @transform_2, window_bounds = array<i64: 1, 32>}, {pipeline_mode = #tpu.pipeline_mode<synchronous>, transform_indices = @transform_3, window_bounds = array<i64: 32, 8>}, {pipeline_mode = #tpu.pipeline_mode<synchronous>, transform_indices = @transform_4, window_bounds = array<i64: 1, 8>}, {pipeline_mode = #tpu.pipeline_mode<synchronous>, transform_indices = @transform_5, window_bounds = array<i64: 32, 8>}, {pipeline_mode = #tpu.pipeline_mode<synchronous>, transform_indices = @transform_6, window_bounds = array<i64: 1, 8>}, {pipeline_mode = #tpu.pipeline_mode<synchronous>, transform_indices = @transform_7, window_bounds = array<i64: 2, 8>}, {pipeline_mode = #tpu.pipeline_mode<synchronous>, transform_indices = @transform_8, window_bounds = array<i64: 8, 32>}, {pipeline_mode = #tpu.pipeline_mode<synchronous>, transform_indices = @transform_9, window_bounds = array<i64: 1, 32>}, {pipeline_mode = #tpu.pipeline_mode<synchronous>, transform_indices = @transform_10, window_bounds = array<i64: 32, 576>}, {pipeline_mode = #tpu.pipeline_mode<synchronous>, transform_indices = @transform_11, window_bounds = array<i64: 1, 576>}, {pipeline_mode = #tpu.pipeline_mode<synchronous>, transform_indices = @transform_12, window_bounds = array<i64: 576, 576>}, {pipeline_mode = #tpu.pipeline_mode<synchronous>, transform_indices = @transform_13, window_bounds = array<i64: 1, 576>}, {pipeline_mode = #tpu.pipeline_mode<synchronous>, transform_indices = @transform_14, window_bounds = array<i64: 1, 128>}]} {
    %c0 = arith.constant 0 : index
    %c0_0 = arith.constant 0 : index
    %0 = vector.load %arg1[%c0, %c0_0] : memref<2x576xf32, #tpu.memory_space<vmem>>, vector<2x576xf32>
    %c0_1 = arith.constant 0 : index
    %c0_2 = arith.constant 0 : index
    %1 = vector.load %arg2[%c0_1, %c0_2] : memref<576x32xf32, #tpu.memory_space<vmem>>, vector<576x32xf32>
    %cst = arith.constant dense<0.000000e+00> : vector<2x32xf32>
    %2 = tpu.matmul %0, %1, %cst {dimension_numbers = #tpu.dot_dimension_numbers<[1], [0], [0], [1], [0, 0, 1, 1], [], []>} : vector<2x576xf32>, vector<576x32xf32>, vector<2x32xf32> -> vector<2x32xf32>
    %c0_3 = arith.constant 0 : index
    %c0_4 = arith.constant 0 : index
    %3 = vector.load %arg3[%c0_3, %c0_4] : memref<1x32xf32, #tpu.memory_space<vmem>>, vector<1x32xf32>
    %4 = vector.broadcast %3 : vector<1x32xf32> to vector<2x32xf32>
    %5 = arith.addf %2, %4 : vector<2x32xf32>
    %cst_5 = arith.constant 0.000000e+00 : f32
    %6 = vector.broadcast %cst_5 : f32 to vector<2x32xf32>
    %7 = arith.maximumf %5, %6 : vector<2x32xf32>
    %c0_6 = arith.constant 0 : index
    %c0_7 = arith.constant 0 : index
    %8 = vector.load %arg4[%c0_6, %c0_7] : memref<32x8xf32, #tpu.memory_space<vmem>>, vector<32x8xf32>
    %cst_8 = arith.constant dense<0.000000e+00> : vector<2x8xf32>
    %9 = tpu.matmul %7, %8, %cst_8 {dimension_numbers = #tpu.dot_dimension_numbers<[1], [0], [0], [1], [0, 0, 1, 1], [], []>} : vector<2x32xf32>, vector<32x8xf32>, vector<2x8xf32> -> vector<2x8xf32>
    %c0_9 = arith.constant 0 : index
    %c0_10 = arith.constant 0 : index
    %10 = vector.load %arg5[%c0_9, %c0_10] : memref<1x8xf32, #tpu.memory_space<vmem>>, vector<1x8xf32>
    %11 = vector.broadcast %10 : vector<1x8xf32> to vector<2x8xf32>
    %12 = arith.addf %9, %11 : vector<2x8xf32>
    %c0_11 = arith.constant 0 : index
    %c0_12 = arith.constant 0 : index
    %13 = vector.load %arg6[%c0_11, %c0_12] : memref<32x8xf32, #tpu.memory_space<vmem>>, vector<32x8xf32>
    %cst_13 = arith.constant dense<0.000000e+00> : vector<2x8xf32>
    %14 = tpu.matmul %7, %13, %cst_13 {dimension_numbers = #tpu.dot_dimension_numbers<[1], [0], [0], [1], [0, 0, 1, 1], [], []>} : vector<2x32xf32>, vector<32x8xf32>, vector<2x8xf32> -> vector<2x8xf32>
    %c0_14 = arith.constant 0 : index
    %c0_15 = arith.constant 0 : index
    %15 = vector.load %arg7[%c0_14, %c0_15] : memref<1x8xf32, #tpu.memory_space<vmem>>, vector<1x8xf32>
    %16 = vector.broadcast %15 : vector<1x8xf32> to vector<2x8xf32>
    %17 = arith.addf %14, %16 : vector<2x8xf32>
    %cst_16 = arith.constant 5.000000e-01 : f32
    %18 = vector.broadcast %cst_16 : f32 to vector<2x8xf32>
    %19 = arith.mulf %18, %17 : vector<2x8xf32>
    %20 = math.exp %19 : vector<2x8xf32>
    %c0_17 = arith.constant 0 : index
    %c0_18 = arith.constant 0 : index
    %21 = vector.load %arg8[%c0_17, %c0_18] : memref<2x8xf32, #tpu.memory_space<vmem>>, vector<2x8xf32>
    %22 = arith.mulf %20, %21 : vector<2x8xf32>
    %23 = arith.addf %12, %22 : vector<2x8xf32>
    %c0_19 = arith.constant 0 : index
    %c0_20 = arith.constant 0 : index
    %24 = vector.load %arg9[%c0_19, %c0_20] : memref<8x32xf32, #tpu.memory_space<vmem>>, vector<8x32xf32>
    %cst_21 = arith.constant dense<0.000000e+00> : vector<2x32xf32>
    %25 = tpu.matmul %23, %24, %cst_21 {dimension_numbers = #tpu.dot_dimension_numbers<[1], [0], [0], [1], [0, 0, 1, 1], [], []>} : vector<2x8xf32>, vector<8x32xf32>, vector<2x32xf32> -> vector<2x32xf32>
    %c0_22 = arith.constant 0 : index
    %c0_23 = arith.constant 0 : index
    %26 = vector.load %arg10[%c0_22, %c0_23] : memref<1x32xf32, #tpu.memory_space<vmem>>, vector<1x32xf32>
    %27 = vector.broadcast %26 : vector<1x32xf32> to vector<2x32xf32>
    %28 = arith.addf %25, %27 : vector<2x32xf32>
    %cst_24 = arith.constant 0.000000e+00 : f32
    %29 = vector.broadcast %cst_24 : f32 to vector<2x32xf32>
    %30 = arith.maximumf %28, %29 : vector<2x32xf32>
    %c0_25 = arith.constant 0 : index
    %c0_26 = arith.constant 0 : index
    %31 = vector.load %arg11[%c0_25, %c0_26] : memref<32x576xf32, #tpu.memory_space<vmem>>, vector<32x576xf32>
    %cst_27 = arith.constant dense<0.000000e+00> : vector<2x576xf32>
    %32 = tpu.matmul %30, %31, %cst_27 {dimension_numbers = #tpu.dot_dimension_numbers<[1], [0], [0], [1], [0, 0, 1, 1], [], []>} : vector<2x32xf32>, vector<32x576xf32>, vector<2x576xf32> -> vector<2x576xf32>
    %c0_28 = arith.constant 0 : index
    %c0_29 = arith.constant 0 : index
    %33 = vector.load %arg12[%c0_28, %c0_29] : memref<1x576xf32, #tpu.memory_space<vmem>>, vector<1x576xf32>
    %34 = vector.broadcast %33 : vector<1x576xf32> to vector<2x576xf32>
    %35 = arith.addf %32, %34 : vector<2x576xf32>
    %36 = arith.negf %35 : vector<2x576xf32>
    %37 = math.exp %36 : vector<2x576xf32>
    %cst_30 = arith.constant 1.000000e+00 : f32
    %38 = vector.broadcast %cst_30 : f32 to vector<2x576xf32>
    %39 = arith.addf %38, %37 : vector<2x576xf32>
    %40 = arith.divf %38, %39 : vector<2x576xf32>
    %cst_31 = arith.constant 1.000000e+00 : f32
    %41 = vector.broadcast %cst_31 : f32 to vector<2x8xf32>
    %42 = arith.addf %41, %17 : vector<2x8xf32>
    %43 = arith.mulf %12, %12 : vector<2x8xf32>
    %44 = arith.subf %42, %43 : vector<2x8xf32>
    %45 = arith.mulf %20, %20 : vector<2x8xf32>
    %46 = arith.subf %44, %45 : vector<2x8xf32>
    %47 = vector.shape_cast %46 : vector<2x8xf32> to vector<1x2x8xf32>
    %cst_32 = arith.constant dense<0.000000e+00> : vector<1xf32>
    %48 = vector.multi_reduction <add>, %47, %cst_32 [1, 2] : vector<1x2x8xf32> to vector<1xf32>
    %49 = vector.shape_cast %48 : vector<1xf32> to vector<1x1x1xf32>
    %50 = vector.extract %49[0, 0, 0] : f32 from vector<1x1x1xf32>
    %cst_33 = arith.constant -5.000000e-01 : f32
    %51 = arith.mulf %cst_33, %50 : f32
    %cst_34 = arith.constant 5.000000e-01 : f32
    %52 = arith.mulf %51, %cst_34 : f32
    %c0_35 = arith.constant 0 : index
    %c0_36 = arith.constant 0 : index
    %53 = vector.load %arg16[%c0_35, %c0_36] : memref<4x576xf32, #tpu.memory_space<vmem>>, vector<2x576xf32>
    tpu.vector_store %arg16[%c0_35, %c0_36], %0 {strides = array<i32>} : memref<4x576xf32, #tpu.memory_space<vmem>>, vector<2x576xf32>,
    %c2 = arith.constant 2 : index
    %c0_37 = arith.constant 0 : index
    %54 = vector.load %arg16[%c2, %c0_37] : memref<4x576xf32, #tpu.memory_space<vmem>>, vector<2x576xf32>
    tpu.vector_store %arg16[%c2, %c0_37], %40 {strides = array<i32>} : memref<4x576xf32, #tpu.memory_space<vmem>>, vector<2x576xf32>,
    %c0_38 = arith.constant 0 : index
    %c0_39 = arith.constant 0 : index
    %55 = vector.load %arg16[%c0_38, %c0_39] : memref<4x576xf32, #tpu.memory_space<vmem>>, vector<4x576xf32>
    %c0_40 = arith.constant 0 : index
    %c0_41 = arith.constant 0 : index
    %56 = vector.load %arg13[%c0_40, %c0_41] : memref<576x576xf32, #tpu.memory_space<vmem>>, vector<576x576xf32>
    %cst_42 = arith.constant dense<0.000000e+00> : vector<4x576xf32>
    %57 = tpu.matmul %55, %56, %cst_42 {dimension_numbers = #tpu.dot_dimension_numbers<[1], [0], [0], [1], [0, 0, 1, 1], [], []>} : vector<4x576xf32>, vector<576x576xf32>, vector<4x576xf32> -> vector<4x576xf32>
    %c0_43 = arith.constant 0 : index
    %c0_44 = arith.constant 0 : index
    %58 = vector.load %arg14[%c0_43, %c0_44] : memref<1x576xf32, #tpu.memory_space<vmem>>, vector<1x576xf32>
    %59 = vector.broadcast %58 : vector<1x576xf32> to vector<4x576xf32>
    %60 = arith.addf %57, %59 : vector<4x576xf32>
    %cst_45 = arith.constant 0.000000e+00 : f32
    %61 = vector.broadcast %cst_45 : f32 to vector<4x576xf32>
    %62 = arith.maximumf %60, %61 : vector<4x576xf32>
    %63 = vector.extract_strided_slice %62 {offsets = [0, 0], sizes = [2, 576], strides = [1, 1]} : vector<4x576xf32> to vector<2x576xf32>
    %64 = vector.extract_strided_slice %62 {offsets = [2, 0], sizes = [2, 576], strides = [1, 1]} : vector<4x576xf32> to vector<2x576xf32>
    %65 = arith.subf %63, %64 : vector<2x576xf32>
    %66 = arith.mulf %65, %65 : vector<2x576xf32>
    %67 = vector.shape_cast %66 : vector<2x576xf32> to vector<1x2x576xf32>
    %cst_46 = arith.constant dense<0.000000e+00> : vector<1xf32>
    %68 = vector.multi_reduction <add>, %67, %cst_46 [1, 2] : vector<1x2x576xf32> to vector<1xf32>
    %69 = vector.shape_cast %68 : vector<1xf32> to vector<1x1x1xf32>
    %70 = vector.extract %69[0, 0, 0] : f32 from vector<1x1x1xf32>
    %cst_47 = arith.constant 5.000000e-01 : f32
    %71 = arith.mulf %70, %cst_47 : f32
    %72 = tpu.iota {dimensions = array<i32: 1>} : vector<1x128xi32>
    %c0_i32 = arith.constant 0 : i32
    %73 = vector.broadcast %c0_i32 : i32 to vector<1x128xi32>
    %74 = arith.cmpi eq, %72, %73 : vector<1x128xi32>
    %c1_i32 = arith.constant 1 : i32
    %75 = vector.broadcast %c1_i32 : i32 to vector<1x128xi32>
    %76 = arith.cmpi eq, %72, %75 : vector<1x128xi32>
    %c2_i32 = arith.constant 2 : i32
    %77 = vector.broadcast %c2_i32 : i32 to vector<1x128xi32>
    %78 = arith.cmpi eq, %72, %77 : vector<1x128xi32>
    %79 = arith.addf %52, %71 : f32
    %cst_48 = arith.constant 0.000000e+00 : f32
    %80 = vector.broadcast %79 : f32 to vector<1x128xf32>
    %81 = vector.broadcast %cst_48 : f32 to vector<1x128xf32>
    %82 = arith.select %78, %80, %81 : vector<1x128xi1>, vector<1x128xf32>
    %83 = vector.broadcast %71 : f32 to vector<1x128xf32>
    %84 = arith.select %76, %83, %82 : vector<1x128xi1>, vector<1x128xf32>
    %85 = vector.broadcast %52 : f32 to vector<1x128xf32>
    %86 = arith.select %74, %85, %84 : vector<1x128xi1>, vector<1x128xf32>
    %c0_49 = arith.constant 0 : index
    %c0_50 = arith.constant 0 : index
    %87 = vector.load %arg15[%c0_49, %c0_50] : memref<1x128xf32, #tpu.memory_space<vmem>>, vector<1x128xf32>
    tpu.vector_store %arg15[%c0_49, %c0_50], %86 {strides = array<i32>} : memref<1x128xf32, #tpu.memory_space<vmem>>, vector<1x128xf32>,
    return
  }
  func.func @transform_0(%arg0: i32) -> (i32, i32) {
    %c0_i32 = arith.constant 0 : i32
    %c0_i32_0 = arith.constant 0 : i32
    %c0_i32_1 = arith.constant 0 : i32
    return %c0_i32, %c0_i32_0 : i32, i32
  }
  func.func @transform_1(%arg0: i32) -> (i32, i32) {
    %c0_i32 = arith.constant 0 : i32
    %c0_i32_0 = arith.constant 0 : i32
    %c0_i32_1 = arith.constant 0 : i32
    return %c0_i32, %c0_i32_0 : i32, i32
  }
  func.func @transform_2(%arg0: i32) -> (i32, i32) {
    %c0_i32 = arith.constant 0 : i32
    %c0_i32_0 = arith.constant 0 : i32
    %c0_i32_1 = arith.constant 0 : i32
    return %c0_i32, %c0_i32_0 : i32, i32
  }
  func.func @transform_3(%arg0: i32) -> (i32, i32) {
    %c0_i32 = arith.constant 0 : i32
    %c0_i32_0 = arith.constant 0 : i32
    %c0_i32_1 = arith.constant 0 : i32
    return %c0_i32, %c0_i32_0 : i32, i32
  }
  func.func @transform_4(%arg0: i32) -> (i32, i32) {
    %c0_i32 = arith.constant 0 : i32
    %c0_i32_0 = arith.constant 0 : i32
    %c0_i32_1 = arith.constant 0 : i32
    return %c0_i32, %c0_i32_0 : i32, i32
  }
  func.func @transform_5(%arg0: i32) -> (i32, i32) {
    %c0_i32 = arith.constant 0 : i32
    %c0_i32_0 = arith.constant 0 : i32
    %c0_i32_1 = arith.constant 0 : i32
    return %c0_i32, %c0_i32_0 : i32, i32
  }
  func.func @transform_6(%arg0: i32) -> (i32, i32) {
    %c0_i32 = arith.constant 0 : i32
    %c0_i32_0 = arith.constant 0 : i32
    %c0_i32_1 = arith.constant 0 : i32
    return %c0_i32, %c0_i32_0 : i32, i32
  }
  func.func @transform_7(%arg0: i32) -> (i32, i32) {
    %c0_i32 = arith.constant 0 : i32
    %c0_i32_0 = arith.constant 0 : i32
    %c0_i32_1 = arith.constant 0 : i32
    return %c0_i32, %c0_i32_0 : i32, i32
  }
  func.func @transform_8(%arg0: i32) -> (i32, i32) {
    %c0_i32 = arith.constant 0 : i32
    %c0_i32_0 = arith.constant 0 : i32
    %c0_i32_1 = arith.constant 0 : i32
    return %c0_i32, %c0_i32_0 : i32, i32
  }
  func.func @transform_9(%arg0: i32) -> (i32, i32) {
    %c0_i32 = arith.constant 0 : i32
    %c0_i32_0 = arith.constant 0 : i32
    %c0_i32_1 = arith.constant 0 : i32
    return %c0_i32, %c0_i32_0 : i32, i32
  }
  func.func @transform_10(%arg0: i32) -> (i32, i32) {
    %c0_i32 = arith.constant 0 : i32
    %c0_i32_0 = arith.constant 0 : i32
    %c0_i32_1 = arith.constant 0 : i32
    return %c0_i32, %c0_i32_0 : i32, i32
  }
  func.func @transform_11(%arg0: i32) -> (i32, i32) {
    %c0_i32 = arith.constant 0 : i32
    %c0_i32_0 = arith.constant 0 : i32
    %c0_i32_1 = arith.constant 0 : i32
    return %c0_i32, %c0_i32_0 : i32, i32
  }
  func.func @transform_12(%arg0: i32) -> (i32, i32) {
    %c0_i32 = arith.constant 0 : i32
    %c0_i32_0 = arith.constant 0 : i32
    %c0_i32_1 = arith.constant 0 : i32
    return %c0_i32, %c0_i32_0 : i32, i32
  }
  func.func @transform_13(%arg0: i32) -> (i32, i32) {
    %c0_i32 = arith.constant 0 : i32
    %c0_i32_0 = arith.constant 0 : i32
    %c0_i32_1 = arith.constant 0 : i32
    return %c0_i32, %c0_i32_0 : i32, i32
  }
  func.func @transform_14(%arg0: i32) -> (i32, i32) {
    %c0_i32 = arith.constant 0 : i32
    %c0_i32_0 = arith.constant 0 : i32
    %c0_i32_1 = arith.constant 0 : i32
    return %c0_i32, %c0_i32_0 : i32, i32
  }
}

</mosaic_0001>

<bundles_post_ra>
// kernel: inter_bn_autoencoder_forward_train.1
= control target key start
LH: loop header
LB: loop body
LE: loop exit
PB: predicated region body
PF: predicated region fallthrough
CT: control target
= control target key end

     0   :  { %19 = vsyncpa [#allocation4], 0  ;;  %s3790_s0 = inlined_call_operand.vmem [shape: f32[2,576], index: 0, kind: input, shape index: {}]   ;;  %s3791_s1 = inlined_call_operand.vmem [shape: f32[576,32], index: 1, kind: input, shape index: {}]   ;;  %s3792_s2 = inlined_call_operand.hbm [shape: f32[1,32], index: 2, kind: input, shape index: {}]   ;;  %s3793_s3 = inlined_call_operand.vmem [shape: f32[32,8], index: 3, kind: input, shape index: {}]   ;;  %s3794_s4 = inlined_call_operand.hbm [shape: f32[1,8], index: 4, kind: input, shape index: {}]   ;;  %s3795_s5 = inlined_call_operand.vmem [shape: f32[32,8], index: 5, kind: input, shape index: {}]   ;;  %s3796_s6 = inlined_call_operand.hbm [shape: f32[1,8], index: 6, kind: input, shape index: {}]   ;;  %s3797_s7 = inlined_call_operand.hbm [shape: f32[2,8], index: 7, kind: input, shape index: {}]   ;;  %s3798_s8 = inlined_call_operand.hbm [shape: f32[8,32], index: 8, kind: input, shape index: {}]   ;;  %s3799_s9 = inlined_call_operand.hbm [shape: f32[1,32], index: 9, kind: input, shape index: {}]   ;;  %s3800_s10 = inlined_call_operand.hbm [shape: f32[32,576], index: 10, kind: input, shape index: {}]   ;;  %s3801_s11 = inlined_call_operand.hbm [shape: f32[1,576], index: 11, kind: input, shape index: {}]   ;;  %s3802_s12 = inlined_call_operand.hbm [shape: f32[576,576], index: 12, kind: input, shape index: {}]   ;;  %s3803_s13 = inlined_call_operand.hbm [shape: f32[1,576], index: 13, kind: input, shape index: {}]   ;;  %s3804_s14 = inlined_call_operand.vmem [shape: f32[1,128], index: 14, kind: output, shape index: {}]  }
   0x1   :  { %20 = vsyncpa [#allocation6], 0 }
   0x2   :  { %21 = vsyncpa [#allocation9], 0 }
   0x3   :  { %22 = vsyncpa [#allocation12], 0 }
   0x4   :  { %23 = vsyncpa [#allocation15], 0 }
   0x5   :  { %24 = vsyncpa [#allocation18], 0  ;;  %s3222_s29 = smov [#allocation5]   ;;  %s3223_s15 = smov [#allocation8]  }
   0x6   :  { %s47_s30 = sshll.u32 %s3222_s29, 4  ;;  %s69_s16 = sshll.u32 %s3223_s15, 4  ;;  %s48_s30 = int_to_ptr.vmem [resolvable:$true] %s47_s30  ;;  %s70_s16 = int_to_ptr.vmem [resolvable:$true] %s69_s16 }
   0x7   :  { %s2990_s19 = scalar_lea.hbm %s3794_s4, 16 }
   0x8   :  { %p2991_p0 = scmp.ne.s32.totalorder %s3794_s4, %s2990_s19  ;;  %p2994_p1 = scmp.lt.u32.totalorder %s2990_s19, %s3794_s4 }
   0xa   :  { %p2996_p2 = pnand %p2994_p1, %p2991_p0 }
   0xc   :  { %2999 = shalt.err (!%p2996_p2)
}
   0xd   :  { %s3000_s24 = scalar_lea.vmem %s48_s30, 16  ;;  %s3004_s25 = scalar_lea.vmem %s48_s30, 32 }
   0xe   :  { %p3001_p3 = scmp.ne.s32.totalorder %s48_s30, %s3000_s24  ;;  %p3005_p4 = scmp.lt.s32.totalorder %s48_s30, %s48_s30 }
   0xf   :  { %p3006_p5 = scmp.lt.s32.totalorder %s3004_s25, %s3000_s24 }
  0x11   :  { %p3007_p6 = por %p3006_p5, %p3005_p4 }
  0x13   :  { %p3008_p7 = pnand %p3007_p6, %p3001_p3 }
  0x15   :  { %3011 = shalt.err (!%p3008_p7)
}
  0x16   :  { %50 = dma.hbm_to_vmem [thread:$0]  %s3794_s4, 16, %s48_s30, [#allocation6]  }
  0x17   :  { %s3012_s15 = scalar_lea.hbm %s3797_s7, 32 }
  0x18   :  { %p3013_p8 = scmp.ne.s32.totalorder %s3797_s7, %s3012_s15  ;;  %p3016_p9 = scmp.lt.u32.totalorder %s3012_s15, %s3797_s7 }
  0x1a   :  { %p3018_p10 = pnand %p3016_p9, %p3013_p8 }
  0x1c   :  { %3021 = shalt.err (!%p3018_p10)
}
  0x1d   :  { %s3022_s21 = scalar_lea.vmem %s70_s16, 32  ;;  %p3027_p12 = scmp.lt.s32.totalorder %s70_s16, %s70_s16 }
  0x1e   :  { %p3023_p11 = scmp.ne.s32.totalorder %s70_s16, %s3022_s21  ;;  %p3028_p13 = scmp.lt.s32.totalorder %s3022_s21, %s3022_s21 }
  0x20   :  { %p3029_p0 = por %p3028_p13, %p3027_p12 }
  0x22   :  { %p3030_p1 = pnand %p3029_p0, %p3023_p11 }
  0x24   :  { %3033 = shalt.err (!%p3030_p1)
}
  0x25   :  { %72 = dma.hbm_to_vmem [thread:$0]  %s3797_s7, 32, %s70_s16, [#allocation9]  }
  0x26   :  { %s3224_s22 = smov [#allocation11]   ;;  %s3225_s24 = smov [#allocation14]  }
  0x27   :  { %s89_s23 = sshll.u32 %s3224_s22, 4  ;;  %s111_s25 = sshll.u32 %s3225_s24, 4  ;;  %s90_s23 = int_to_ptr.vmem [resolvable:$true] %s89_s23  ;;  %s112_s25 = int_to_ptr.vmem [resolvable:$true] %s111_s25 }
  0x28   :  { %s3034_s28 = scalar_lea.hbm %s3799_s9, 16 }
  0x29   :  { %p3035_p2 = scmp.ne.s32.totalorder %s3799_s9, %s3034_s28  ;;  %p3038_p3 = scmp.lt.u32.totalorder %s3034_s28, %s3799_s9 }
  0x2b   :  { %p3040_p4 = pnand %p3038_p3, %p3035_p2 }
  0x2d   :  { %3043 = shalt.err (!%p3040_p4)
}
  0x2e   :  { %s3044_s7 = scalar_lea.vmem %s90_s23, 16  ;;  %s3048_s16 = scalar_lea.vmem %s90_s23, 32 }
  0x2f   :  { %p3045_p5 = scmp.ne.s32.totalorder %s90_s23, %s3044_s7  ;;  %p3049_p6 = scmp.lt.s32.totalorder %s90_s23, %s90_s23 }
  0x30   :  { %p3050_p7 = scmp.lt.s32.totalorder %s3048_s16, %s3044_s7 }
  0x32   :  { %p3051_p8 = por %p3050_p7, %p3049_p6 }
  0x34   :  { %p3052_p9 = pnand %p3051_p8, %p3045_p5 }
  0x36   :  { %3055 = shalt.err (!%p3052_p9)
}
  0x37   :  { %92 = dma.hbm_to_vmem [thread:$0]  %s3799_s9, 16, %s90_s23, [#allocation12]  }
  0x38   :  { %s3056_s30 = scalar_lea.hbm %s3801_s11, 80 }
  0x39   :  { %p3057_p10 = scmp.ne.s32.totalorder %s3801_s11, %s3056_s30  ;;  %p3060_p11 = scmp.lt.u32.totalorder %s3056_s30, %s3801_s11 }
  0x3b   :  { %p3062_p12 = pnand %p3060_p11, %p3057_p10 }
  0x3d   :  { %3065 = shalt.err (!%p3062_p12)
}
  0x3e   :  { %s3066_s28 = scalar_lea.vmem %s112_s25, 80  ;;  %s3070_s29 = scalar_lea.vmem %s112_s25, 96 }
  0x3f   :  { %p3067_p13 = scmp.ne.s32.totalorder %s112_s25, %s3066_s28  ;;  %p3071_p0 = scmp.lt.s32.totalorder %s112_s25, %s112_s25 }
  0x40   :  { %p3072_p1 = scmp.lt.s32.totalorder %s3070_s29, %s3066_s28 }
  0x42   :  { %p3073_p2 = por %p3072_p1, %p3071_p0 }
  0x44   :  { %p3074_p3 = pnand %p3073_p2, %p3067_p13 }
  0x46   :  { %3077 = shalt.err (!%p3074_p3)
}
  0x47   :  { %114 = dma.hbm_to_vmem [thread:$0]  %s3801_s11, 80, %s112_s25, [#allocation15]  }
  0x48   :  { %s3226_s15 = smov [#allocation3]   ;;  %s3227_s18 = smov [#allocation7]  }
  0x49   :  { %s35_s17 = sshll.u32 %s3226_s15, 4  ;;  %s59_s7 = sshll.u32 %s3227_s18, 4  ;;  %s36_s17 = int_to_ptr.vmem [resolvable:$true] %s35_s17  ;;  %s60_s7 = int_to_ptr.vmem [resolvable:$true] %s59_s7 }
  0x4a   :  { %s3078_s20 = scalar_lea.hbm %s3792_s2, 16 }
  0x4b   :  { %p3079_p4 = scmp.ne.s32.totalorder %s3792_s2, %s3078_s20  ;;  %p3082_p5 = scmp.lt.u32.totalorder %s3078_s20, %s3792_s2 }
  0x4d   :  { %p3084_p6 = pnand %p3082_p5, %p3079_p4 }
  0x4f   :  { %3087 = shalt.err (!%p3084_p6)
}
  0x50   :  { %s3088_s11 = scalar_lea.vmem %s36_s17, 16  ;;  %s3092_s25 = scalar_lea.vmem %s36_s17, 32 }
  0x51   :  { %p3089_p7 = scmp.ne.s32.totalorder %s36_s17, %s3088_s11  ;;  %p3093_p8 = scmp.lt.s32.totalorder %s36_s17, %s36_s17 }
  0x52   :  { %p3094_p9 = scmp.lt.s32.totalorder %s3092_s25, %s3088_s11 }
  0x54   :  { %p3095_p10 = por %p3094_p9, %p3093_p8 }
  0x56   :  { %p3096_p11 = pnand %p3095_p10, %p3089_p7 }
  0x58   :  { %3099 = shalt.err (!%p3096_p11)
}
  0x59   :  { %38 = dma.hbm_to_vmem [thread:$0]  %s3792_s2, 16, %s36_s17, [#allocation4]  }
  0x5a   :  { %s3100_s29 = scalar_lea.hbm %s3796_s6, 16 }
  0x5b   :  { %p3101_p12 = scmp.ne.s32.totalorder %s3796_s6, %s3100_s29  ;;  %p3104_p13 = scmp.lt.u32.totalorder %s3100_s29, %s3796_s6 }
  0x5d   :  { %p3106_p0 = pnand %p3104_p13, %p3101_p12 }
  0x5f   :  { %3109 = shalt.err (!%p3106_p0)
}
  0x60   :  { %s3110_s16 = scalar_lea.vmem %s60_s7, 16  ;;  %s3114_s19 = scalar_lea.vmem %s60_s7, 32 }
  0x61   :  { %p3111_p1 = scmp.ne.s32.totalorder %s60_s7, %s3110_s16  ;;  %p3115_p2 = scmp.lt.s32.totalorder %s60_s7, %s60_s7 }
  0x62   :  { %p3116_p3 = scmp.lt.s32.totalorder %s3114_s19, %s3110_s16 }
  0x64   :  { %p3117_p4 = por %p3116_p3, %p3115_p2 }
  0x66   :  { %p3118_p5 = pnand %p3117_p4, %p3111_p1 }
  0x68   :  { %3121 = shalt.err (!%p3118_p5)
}
  0x69   :  { %62 = dma.hbm_to_vmem [thread:$0]  %s3796_s6, 16, %s60_s7, [#allocation6]  }
  0x6a   :  { %s3228_s20 = smov [#allocation10]   ;;  %s3229_s4 = smov [#allocation13]  }
  0x6b   :  { %s79_s21 = sshll.u32 %s3228_s20, 4  ;;  %s98_s30 = sshll.u32 %s3229_s4, 4  ;;  %s80_s21 = int_to_ptr.vmem [resolvable:$true] %s79_s21  ;;  %s3385_s30 = int_to_ptr.vmem [resolvable:$true] %s98_s30 }
  0x6c   :  { %s3122_s25 = scalar_lea.hbm %s3798_s8, 128 }
  0x6d   :  { %p3123_p6 = scmp.ne.s32.totalorder %s3798_s8, %s3122_s25  ;;  %p3126_p7 = scmp.lt.u32.totalorder %s3122_s25, %s3798_s8 }
  0x6f   :  { %p3128_p8 = pnand %p3126_p7, %p3123_p6 }
  0x71   :  { %3131 = shalt.err (!%p3128_p8)
}
  0x72   :  { %s3132_s6 = scalar_lea.vmem %s80_s21, 128  ;;  %p3137_p10 = scmp.lt.s32.totalorder %s80_s21, %s80_s21 }
  0x73   :  { %p3133_p9 = scmp.ne.s32.totalorder %s80_s21, %s3132_s6  ;;  %p3138_p11 = scmp.lt.s32.totalorder %s3132_s6, %s3132_s6 }
  0x75   :  { %p3139_p12 = por %p3138_p11, %p3137_p10 }
  0x77   :  { %p3140_p13 = pnand %p3139_p12, %p3133_p9 }
  0x79   :  { %3143 = shalt.err (!%p3140_p13)
}
  0x7a   :  { %82 = dma.hbm_to_vmem [thread:$0]  %s3798_s8, 128, %s80_s21, [#allocation9]  }
  0x7b   :  { %s3144_s15 = scalar_lea.hbm %s3800_s10, 2560 }
  0x7c   :  { %p3145_p0 = scmp.ne.s32.totalorder %s3800_s10, %s3144_s15  ;;  %p3148_p1 = scmp.lt.u32.totalorder %s3144_s15, %s3800_s10 }
  0x7e   :  { %p3150_p2 = pnand %p3148_p1, %p3145_p0 }
  0x80   :  { %3153 = shalt.err (!%p3150_p2)
}
  0x81   :  { %s3154_s17 = scalar_lea.vmem %s3385_s30, 2560  ;;  %p3159_p4 = scmp.lt.s32.totalorder %s3385_s30, %s3385_s30 }
  0x82   :  { %p3155_p3 = scmp.ne.s32.totalorder %s3385_s30, %s3154_s17  ;;  %p3160_p5 = scmp.lt.s32.totalorder %s3154_s17, %s3154_s17 }
  0x84   :  { %p3161_p6 = por %p3160_p5, %p3159_p4 }
  0x86   :  { %p3162_p7 = pnand %p3161_p6, %p3155_p3 }
  0x88   :  { %3165 = shalt.err (!%p3162_p7)
}
  0x89   :  { %s3230_s8 = smov 640   ;;  %s3231_s20 = smov 40  }
  0x8a   :  { %104 = dma.hbm_to_vmem [thread:$0]  %s3800_s10, 2560, %s3385_s30, [#allocation12], %s3230_s8, %s3230_s8, %s3231_s20  }
  0x8b   :  { %s3232_s22 = smov [#allocation16]   ;;  %s3233_s25 = smov [#allocation17]  }
  0x8c   :  { %s120_s11 = sshll.u32 %s3232_s22, 4  ;;  %s133_s24 = sshll.u32 %s3233_s25, 4  ;;  %s121_s11 = int_to_ptr.vmem [resolvable:$true] %s120_s11  ;;  %s134_s24 = int_to_ptr.vmem [resolvable:$true] %s133_s24 }
  0x8d   :  { %s3166_s28 = scalar_lea.hbm %s3802_s12, 46080 }
  0x8e   :  { %p3167_p8 = scmp.ne.s32.totalorder %s3802_s12, %s3166_s28  ;;  %p3170_p9 = scmp.lt.u32.totalorder %s3166_s28, %s3802_s12 }
  0x90   :  { %p3172_p10 = pnand %p3170_p9, %p3167_p8 }
  0x92   :  { %3175 = shalt.err (!%p3172_p10)
}
  0x93   :  { %s3176_s10 = scalar_lea.vmem %s121_s11, 46080  ;;  %p3181_p12 = scmp.lt.s32.totalorder %s121_s11, %s121_s11 }
  0x94   :  { %p3177_p11 = scmp.ne.s32.totalorder %s121_s11, %s3176_s10  ;;  %p3182_p13 = scmp.lt.s32.totalorder %s3176_s10, %s3176_s10 }
  0x96   :  { %p3183_p0 = por %p3182_p13, %p3181_p12 }
  0x98   :  { %p3184_p1 = pnand %p3183_p0, %p3177_p11 }
  0x9a   :  { %3187 = shalt.err (!%p3184_p1)
}
  0x9b   :  { %126 = dma.hbm_to_vmem [thread:$0]  %s3802_s12, 46080, %s121_s11, [#allocation15], %s3230_s8, %s3230_s8, %s3231_s20  }
  0x9c   :  { %s3188_s16 = scalar_lea.hbm %s3803_s13, 80 }
  0x9d   :  { %p3189_p2 = scmp.ne.s32.totalorder %s3803_s13, %s3188_s16  ;;  %p3192_p3 = scmp.lt.u32.totalorder %s3188_s16, %s3803_s13 }
  0x9f   :  { %p3194_p4 = pnand %p3192_p3, %p3189_p2 }
  0xa1   :  { %3197 = shalt.err (!%p3194_p4)
}
  0xa2   :  { %s3198_s4 = scalar_lea.vmem %s134_s24, 80  ;;  %s3202_s22 = scalar_lea.vmem %s134_s24, 96 }
  0xa3   :  { %p3199_p5 = scmp.ne.s32.totalorder %s134_s24, %s3198_s4  ;;  %p3203_p6 = scmp.lt.s32.totalorder %s134_s24, %s134_s24 }
  0xa4   :  { %p3204_p7 = scmp.lt.s32.totalorder %s3202_s22, %s3198_s4 }
  0xa6   :  { %p3205_p8 = por %p3204_p7, %p3203_p6 }
  0xa8   :  { %p3206_p9 = pnand %p3205_p8, %p3199_p5 }
  0xaa   :  { %3209 = shalt.err (!%p3206_p9)
}
  0xab   :  { %136 = dma.hbm_to_vmem [thread:$0]  %s3803_s13, 80, %s134_s24, [#allocation18]  }
  0xac   :  { %3210 = dma.done.wait [#allocation4], 16  }
  0xad   :  { %3211 = vsyncadd [#allocation4], 4294967280 }
  0xae   :  { %3212 = dma.done.wait [#allocation6], 32  }
  0xaf   :  { %3213 = vsyncadd [#allocation6], 4294967264 }
  0xb0   :  { %3214 = dma.done.wait [#allocation9], 160  }
  0xb1   :  { %3215 = vsyncadd [#allocation9], 4294967136 }
  0xb2   :  { %3216 = dma.done.wait [#allocation12], 2576  }
  0xb3   :  { %3217 = vsyncadd [#allocation12], 4294964720 }
  0xb4   :  { %3218 = dma.done.wait [#allocation15], 46160  }
  0xb5   :  { %3219 = vsyncadd [#allocation15], 4294921136 }
  0xb6   :  { %3220 = dma.done.wait [#allocation18], 80  }
  0xb7   :  { %3221 = vsyncadd [#allocation18], 4294967216  ;;  %v185_v0 = vld [vmem:[%s3791_s1 + $0x80] sm:$0xff]  ;;  %v186_v1 = vld [vmem:[%s3791_s1 + $0x88] sm:$0xff]  ;;  %v3234_v43 = vmov 1983009808   ;;  %v254_v45 = vlaneseq }
  0xb8   :  { %v169_v2 = vld [vmem:[%s3791_s1] sm:$0xff]  ;;  %v2460_v3 = vpack.c.bf16 %v186_v1, %v185_v0  ;;  %v170_v4 = vld [vmem:[%s3791_s1 + $0x8] sm:$0xff]  ;;  %v187_v11 = vld [vmem:[%s3791_s1 + $0x90] sm:$0xff]  ;;  %v252_v44 = vunpack.c.l.s4 %v3234_v43  ;;  %vm1060_vm0 = vcmask 517120   ;;  %vm3236_vm1 = vmmov 0  }
  0xb9   :  { %v217_v5 = vld [vmem:[%s3791_s1 + $0x180] sm:$0xff]  ;;  %v218_v6 = vld [vmem:[%s3791_s1 + $0x188] sm:$0xff]  ;;  %v2462_v7 = vpack.c.bf16 %v170_v4, %v169_v2  ;;  %v188_v13 = vld [vmem:[%s3791_s1 + $0x98] sm:$0xff]  ;;  %v3558_v60 = vshrl.u32 %v254_v45, 7  ;;  %vm278_vm2 = vcmask 523264   ;;  %vm503_vm3 = vcmask 261120  }
  0xba   :  { %v2492_v8 = vpack.c.bf16 %v218_v6, %v217_v5  ;;  %v201_v9 = vld [vmem:[%s3791_s1 + $0x100] sm:$0xff]  ;;  %v202_v10 = vld [vmem:[%s3791_s1 + $0x108] sm:$0xff]  ;;  %2461 = vmatprep.subr.bf16.mxu0 %v2460_v3  ;;  %v171_v14 = vld [vmem:[%s3791_s1 + $0x10] sm:$0xff]  ;;  %v2464_v16 = vpack.c.bf16 %v188_v13, %v187_v11  ;;  %v253_v59 = vunpack.c.0.s8 %v252_v44  ;;  %vm672_vm4 = vcmask 64512  }
  0xbb   :  { %v2494_v12 = vpack.c.bf16 %v202_v10, %v201_v9  ;;  %v172_v15 = vld [vmem:[%s3791_s1 + $0x18] sm:$0xff]  ;;  %2463 = vmatpush3.bf16.msra.mxu0 %v2462_v7  ;;  %v219_v18 = vld [vmem:[%s3791_s1 + $0x190] sm:$0xff]  ;;  %v189_v23 = vld [vmem:[%s3791_s1 + $0xa0] sm:$0xff]  ;;  %vm1044_vm5 = vcmask 58368   ;;  %vm1077_vm6 = vcmask 519170   ;;  %vm2144_vm7 = vcmask 1041408  }
  0xbc   :  { %2493 = vmatprep.subr.bf16.mxu1 %v2492_v8  ;;  %v2466_v17 = vpack.c.bf16 %v172_v15, %v171_v14  ;;  %v220_v19 = vld [vmem:[%s3791_s1 + $0x198] sm:$0xff]  ;;  %v203_v20 = vld [vmem:[%s3791_s1 + $0x110] sm:$0xff]  ;;  %v190_v24 = vld [vmem:[%s3791_s1 + $0xa8] sm:$0xff]  ;;  %2465 = vmatprep.subr.bf16.mxu0 %v2464_v16  ;;  %v256_v10 = vsub.s32 %v253_v59, %v3558_v60 }
  0xbd   :  { %2495 = vmatpush3.bf16.msra.mxu1 %v2494_v12  ;;  %v2496_v21 = vpack.c.bf16 %v220_v19, %v219_v18  ;;  %v204_v22 = vld [vmem:[%s3791_s1 + $0x118] sm:$0xff]  ;;  %v2468_v26 = vpack.c.bf16 %v190_v24, %v189_v23  ;;  %v173_v27 = vld [vmem:[%s3791_s1 + $0x20] sm:$0xff]  ;;  %v174_v28 = vld [vmem:[%s3791_s1 + $0x28] sm:$0xff] }
  0xbe   :  { %v2498_v25 = vpack.c.bf16 %v204_v22, %v203_v20  ;;  %v221_v29 = vld [vmem:[%s3791_s1 + $0x1a0] sm:$0xff]  ;;  %v222_v30 = vld [vmem:[%s3791_s1 + $0x1a8] sm:$0xff]  ;;  %v2470_v33 = vpack.c.bf16 %v174_v28, %v173_v27  ;;  %v191_v35 = vld [vmem:[%s3791_s1 + $0xb0] sm:$0xff] }
  0xbf   :  { %2497 = vmatprep.subr.bf16.mxu1 %v2496_v21  ;;  %v205_v31 = vld [vmem:[%s3791_s1 + $0x120] sm:$0xff]  ;;  %v206_v32 = vld [vmem:[%s3791_s1 + $0x128] sm:$0xff]  ;;  %2467 = vmatpush3.bf16.msra.mxu0 %v2466_v17  ;;  %v2500_v34 = vpack.c.bf16 %v222_v30, %v221_v29  ;;  %v192_v36 = vld [vmem:[%s3791_s1 + $0xb8] sm:$0xff] }
  0xc0   :  { %v175_v37 = vld [vmem:[%s3791_s1 + $0x30] sm:$0xff]  ;;  %2469 = vmatprep.subr.bf16.mxu0 %v2468_v26  ;;  %v2502_v38 = vpack.c.bf16 %v206_v32, %v205_v31  ;;  %v2472_v39 = vpack.c.bf16 %v192_v36, %v191_v35  ;;  %v176_v40 = vld [vmem:[%s3791_s1 + $0x38] sm:$0xff]  ;;  %v193_v49 = vld [vmem:[%s3791_s1 + $0xc0] sm:$0xff] }
  0xc1   :  { %2499 = vmatpush3.bf16.msra.mxu1 %v2498_v25  ;;  %v223_v41 = vld [vmem:[%s3791_s1 + $0x1b0] sm:$0xff]  ;;  %v224_v42 = vld [vmem:[%s3791_s1 + $0x1b8] sm:$0xff]  ;;  %v194_v50 = vld [vmem:[%s3791_s1 + $0xc8] sm:$0xff]  ;;  %v2474_v51 = vpack.c.bf16 %v176_v40, %v175_v37 }
  0xc2   :  { %2501 = vmatprep.subr.bf16.mxu1 %v2500_v34  ;;  %v2504_v46 = vpack.c.bf16 %v224_v42, %v223_v41  ;;  %v207_v47 = vld [vmem:[%s3791_s1 + $0x130] sm:$0xff]  ;;  %v208_v48 = vld [vmem:[%s3791_s1 + $0x138] sm:$0xff]  ;;  %v225_v52 = vld [vmem:[%s3791_s1 + $0x1c0] sm:$0xff]  ;;  %v2476_v55 = vpack.c.bf16 %v194_v50, %v193_v49  ;;  %v3235_v49 = vmov 0.0|0.0  }
  0xc3   :  { %2471 = vmatpush3.bf16.msra.mxu0 %v2470_v33  ;;  %v226_v53 = vld [vmem:[%s3791_s1 + $0x1c8] sm:$0xff]  ;;  %v2506_v54 = vpack.c.bf16 %v208_v48, %v207_v47  ;;  %v177_v56 = vld [vmem:[%s3791_s1 + $0x40] sm:$0xff]  ;;  %v195_v63 = vld [vmem:[%s3791_s1 + $0xd0] sm:$0xff] }
  0xc4   :  { %2473 = vmatprep.subr.bf16.mxu0 %v2472_v39  ;;  %v178_v57 = vld [vmem:[%s3791_s1 + $0x48] sm:$0xff]  ;;  %v209_v58 = vld [vmem:[%s3791_s1 + $0x140] sm:$0xff]  ;;  %v2508_v61 = vpack.c.bf16 %v226_v53, %v225_v52  ;;  %v196_v0 = vld [vmem:[%s3791_s1 + $0xd8] sm:$0xff] }
  0xc5   :  { %2503 = vmatpush3.bf16.msra.mxu1 %v2502_v38  ;;  %v210_v62 = vld [vmem:[%s3791_s1 + $0x148] sm:$0xff]  ;;  %v227_v1 = vld [vmem:[%s3791_s1 + $0x1d0] sm:$0xff]  ;;  %v228_v2 = vld [vmem:[%s3791_s1 + $0x1d8] sm:$0xff]  ;;  %v2478_v3 = vpack.c.bf16 %v178_v57, %v177_v56  ;;  %v2480_v6 = vpack.c.bf16 %v196_v0, %v195_v63 }
  0xc6   :  { %2505 = vmatprep.subr.bf16.mxu1 %v2504_v46  ;;  %v179_v4 = vld [vmem:[%s3791_s1 + $0x50] sm:$0xff]  ;;  %v2510_v5 = vpack.c.bf16 %v210_v62, %v209_v58  ;;  %v180_v7 = vld [vmem:[%s3791_s1 + $0x58] sm:$0xff]  ;;  %v2512_v11 = vpack.c.bf16 %v228_v2, %v227_v1  ;;  %v197_v12 = vld [vmem:[%s3791_s1 + $0xe0] sm:$0xff] }
  0xc7   :  { %2475 = vmatpush3.bf16.msra.mxu0 %v2474_v51  ;;  %v211_v8 = vld [vmem:[%s3791_s1 + $0x150] sm:$0xff]  ;;  %v212_v9 = vld [vmem:[%s3791_s1 + $0x158] sm:$0xff]  ;;  %v198_v13 = vld [vmem:[%s3791_s1 + $0xe8] sm:$0xff]  ;;  %v2482_v16 = vpack.c.bf16 %v180_v7, %v179_v4 }
  0xc8   :  { %2477 = vmatprep.subr.bf16.mxu0 %v2476_v55  ;;  %v229_v14 = vld [vmem:[%s3791_s1 + $0x1e0] sm:$0xff]  ;;  %v230_v15 = vld [vmem:[%s3791_s1 + $0x1e8] sm:$0xff]  ;;  %v2514_v17 = vpack.c.bf16 %v212_v9, %v211_v8  ;;  %v2484_v19 = vpack.c.bf16 %v198_v13, %v197_v12  ;;  %v199_v27 = vld [vmem:[%s3791_s1 + $0xf0] sm:$0xff]  ;;  %v3237_v55 = vmov 0.0  }
  0xc9   :  { %2507 = vmatpush3.bf16.msra.mxu1 %v2506_v54  ;;  %v167_v18 = vld [vmem:[%s3790_s0] sm:$0xff]  ;;  %v182_v21 = vld [vmem:[%s3791_s1 + $0x68] sm:$0xff]  ;;  %v2516_v25 = vpack.c.bf16 %v230_v15, %v229_v14  ;;  %v200_v28 = vld [vmem:[%s3791_s1 + $0xf8] sm:$0xff] }
  0xca   :  { %2509 = vmatprep.subr.bf16.mxu1 %v2508_v61  ;;  %v181_v20 = vld [vmem:[%s3791_s1 + $0x60] sm:$0xff]  ;;  %v257_v23 = vrot.slane %v167_v18, %v256_v10  ;;  %2204 = vst.sshfl [vmem:[#allocation2] sm:$0xf pattern:$0x76325410] %v167_v18  ;;  %v250_v24 = vcombine.high %v167_v18, %v167_v18  ;;  %v214_v26 = vld [vmem:[%s3791_s1 + $0x168] sm:$0xff]  ;;  %v2488_v36 = vpack.c.bf16 %v200_v28, %v199_v27 }
  0xcb   :  { %2479 = vmatpush3.bf16.msra.mxu0 %v2478_v3  ;;  %v213_v22 = vld [vmem:[%s3791_s1 + $0x160] sm:$0xff]  ;;  %v231_v29 = vld [vmem:[%s3791_s1 + $0x1f0] sm:$0xff]  ;;  %v232_v30 = vld [vmem:[%s3791_s1 + $0x1f8] sm:$0xff]  ;;  %v2486_v33 = vpack.c.bf16 %v182_v21, %v181_v20 }
  0xcc   :  { %2481 = vmatprep.subr.bf16.mxu0 %v2480_v6  ;;  %v265_v31 = vcombine.high %v257_v23, %v257_v23  ;;  %v264_v32 = vrot.slane %v250_v24, %v256_v10  ;;  %2205 = vst.sshfl [vmem:[#allocation2 + $0x8] sm:$0xf pattern:$0x76325410] %v250_v24  ;;  %v2518_v35 = vpack.c.bf16 %v214_v26, %v213_v22  ;;  %v183_v37 = vld [vmem:[%s3791_s1 + $0x70] sm:$0xff]  ;;  %v184_v38 = vld [vmem:[%s3791_s1 + $0x78] sm:$0xff] }
  0xcd   :  { %2511 = vmatpush3.bf16.msra.mxu1 %v2510_v5  ;;  %v2188_v34 = vld.sshfl [vmem:[%s3790_s0 + $0x8] sm:$0x3 pattern:$0x76325410]  ;;  %v2520_v40 = vpack.c.bf16 %v232_v30, %v231_v29  ;;  %v215_v41 = vld [vmem:[%s3791_s1 + $0x170] sm:$0xff]  ;;  %v216_v42 = vld [vmem:[%s3791_s1 + $0x178] sm:$0xff]  ;;  %v2490_v43 = vpack.c.bf16 %v184_v38, %v183_v37 }
  0xce   :  { %2513 = vmatprep.subr.bf16.mxu1 %v2512_v11  ;;  %v266_v39 = vcombine.high %v264_v32, %v264_v32  ;;  %1061 = vst.msk [vmem:[#allocation2 + $0x10] sm:$0x3] %vm1060_vm0, %v2188_v34  ;;  %345 = vmatprep.mubr.f32.mxu0 %v265_v31  ;;  %v2522_v44 = vpack.c.bf16 %v216_v42, %v215_v41  ;;  %v233_v46 = vld [vmem:[%s3791_s1 + $0x200] sm:$0xff]  ;;  %v234_v47 = vld [vmem:[%s3791_s1 + $0x208] sm:$0xff]  ;;  %v235_v50 = vld [vmem:[%s3791_s1 + $0x210] sm:$0xff] }
  0xcf   :  { %2483 = vmatpush3.bf16.msra.mxu0 %v2482_v16  ;;  %v2525_v48 = vpack.c.bf16 %v234_v47, %v233_v46  ;;  %v236_v51 = vld [vmem:[%s3791_s1 + $0x218] sm:$0xff]  ;;  %v237_v53 = vld [vmem:[%s3791_s1 + $0x220] sm:$0xff]  ;;  %v238_v54 = vld [vmem:[%s3791_s1 + $0x228] sm:$0xff] }
  0xd0   :  { %2485 = vmatprep.subr.bf16.mxu0 %v2484_v19  ;;  %415 = vmatprep.mubr.f32.mxu1 %v266_v39  ;;  %v2528_v52 = vpack.c.bf16 %v236_v51, %v235_v50  ;;  %v2531_v56 = vpack.c.bf16 %v238_v54, %v237_v53  ;;  %v239_v57 = vld [vmem:[%s3791_s1 + $0x230] sm:$0xff]  ;;  %v240_v58 = vld [vmem:[%s3791_s1 + $0x238] sm:$0xff]  ;;  %v492_v61 = vld [vmem:[%s3793_s3] sm:$0xff] }
  0xd1   :  { %2515 = vmatpush3.bf16.msra.mxu1 %v2514_v17  ;;  %v2534_v59 = vpack.c.bf16 %v240_v58, %v239_v57  ;;  %v493_v62 = vld [vmem:[%s3793_s3 + $0x8] sm:$0xff]  ;;  %v494_v0 = vld [vmem:[%s3793_s3 + $0x10] sm:$0xff]  ;;  %v495_v1 = vld [vmem:[%s3793_s3 + $0x18] sm:$0xff] }
  0xd2   :  { %2517 = vmatprep.subr.bf16.mxu1 %v2516_v25  ;;  %v2537_v63 = vpack.c.bf16 %v493_v62, %v492_v61  ;;  %v2540_v2 = vpack.c.bf16 %v495_v1, %v494_v0  ;;  %v2187_v4 = vld [vmem:[#allocation3] ss:$0 sm:$0xff]  ;;  %v577_v12 = vld [vmem:[%s3795_s5] sm:$0xff]  ;;  %v578_v13 = vld [vmem:[%s3795_s5 + $0x8] sm:$0xff] }
  0xd3   :  { %2487 = vmatpush3.bf16.msra.mxu0 %v2486_v33  ;;  %v2543_v17 = vpack.c.bf16 %v578_v13, %v577_v12  ;;  %v579_v19 = vld [vmem:[%s3795_s5 + $0x10] sm:$0xff]  ;;  %v580_v20 = vld [vmem:[%s3795_s5 + $0x18] sm:$0xff]  ;;  %v747_v47 = vld [vmem:[#allocation13] sm:$0xff] }
  0xd4   :  { %2489 = vmatprep.subr.bf16.mxu0 %v2488_v36  ;;  %v2546_v21 = vpack.c.bf16 %v580_v20, %v579_v19  ;;  %v664_v22 = vld [vmem:[#allocation10] sm:$0xff]  ;;  %v2190_v25 = vld [vmem:[#allocation5] ss:$0 sm:$0xff]  ;;  %v2192_v26 = vld [vmem:[#allocation7] ss:$0 sm:$0xff] }
  0xd5   :  { %2519 = vmatpush3.bf16.msra.mxu1 %v2518_v35  ;;  %v661_v36 = vld [vmem:[#allocation8] sm:$0x3]  ;;  %v750_v50 = vld [vmem:[#allocation13 + $0x18] sm:$0xff]  ;;  %v760_v1 = vld [vmem:[#allocation13 + $0x68] sm:$0xff] }
  0xd6   :  { %2521 = vmatprep.subr.bf16.mxu1 %v2520_v40  ;;  %v749_v53 = vld [vmem:[#allocation13 + $0x10] sm:$0xff]  ;;  %v754_v54 = vld [vmem:[#allocation13 + $0x38] sm:$0xff]  ;;  %v756_v19 = vld [vmem:[#allocation13 + $0x48] sm:$0xff] }
  0xd7   :  { %2491 = vmatpush3.bf16.msra.mxu0 %v2490_v43  ;;  %v748_v43 = vld [vmem:[#allocation13 + $0x8] sm:$0xff]  ;;  %v2558_v57 = vpack.c.bf16 %v754_v54, %v749_v53  ;;  %v758_v58 = vld [vmem:[#allocation13 + $0x58] sm:$0xff]  ;;  %v757_v62 = vld [vmem:[#allocation13 + $0x50] sm:$0xff] }
  0xd8   :  { %2524 = vmatprep.subr.bf16.mxu0 %v3235_v49 }
  0xd9   :  { %2523 = vmatpush3.bf16.msra.mxu1 %v2522_v44  ;;  %v753_v44 = vld [vmem:[#allocation13 + $0x30] sm:$0xff] }
  0xda   :  { %2536 = vmatprep.subr.bf16.mxu1 %v3235_v49  ;;  %346 = vmatmul.mubr.f32.vlgmr.msra.gmra.mrb[0].mxu0 %v257_v23  ;;  %v2548_v46 = vpack.c.bf16 %v753_v44, %v748_v43  ;;  %v1095_v43 = vld [vmem:[#allocation16 + $0x68] sm:$0xff] }
  0xdb   :  { %2526 = vmatpush3.bf16.msra.mxu0 %v2525_v48  ;;  %2400 = vmatprep.mubr.msk.f32.mxu0 %vm3236_vm1, %v3237_v55  ;;  %v752_v48 = vld [vmem:[#allocation13 + $0x28] sm:$0xff] }
  0xdc   :  { %416 = vmatmul.mubr.f32.vlgmr.msra.gmra.mrb[0].mxu1 %v264_v32  ;;  %2527 = vmatprep.subr.bf16.mxu0 %v3235_v49  ;;  %v2550_v51 = vpack.c.bf16 %v752_v48, %v747_v47  ;;  %v1102_v48 = vld [vmem:[#allocation16 + $0xa0] sm:$0xff] }
  0xdd   :  { %2411 = vmatprep.mubr.msk.f32.mxu1 %vm3236_vm1, %v3237_v55  ;;  %2538 = vmatpush3.bf16.msra.mxu1 %v2537_v63  ;;  %v762_v63 = vld [vmem:[#allocation13 + $0x78] sm:$0xff] }
  0xde   :  { %2539 = vmatprep.subr.bf16.mxu1 %v3235_v49  ;;  %v2554_v0 = vpack.c.bf16 %v762_v63, %v757_v62  ;;  %v1112_v63 = vld [vmem:[#allocation16 + $0xf0] sm:$0xff] }
  0xdf   :  { %2529 = vmatpush3.bf16.msra.mxu0 %v2528_v52  ;;  %v755_v52 = vld [vmem:[#allocation13 + $0x40] sm:$0xff] }
  0xe0   :  { %2530 = vmatprep.subr.bf16.mxu0 %v3235_v49 }
  0xe1   :  { %2541 = vmatpush3.bf16.msra.mxu1 %v2540_v2  ;;  %v765_v2 = vld [vmem:[#allocation13 + $0x90] sm:$0xff] }
  0xe2   :  { %2542 = vmatprep.subr.bf16.mxu1 %v3235_v49 }
  0xe3   :  { %2532 = vmatpush3.bf16.msra.mxu0 %v2531_v56  ;;  %v2556_v56 = vpack.c.bf16 %v755_v52, %v750_v50  ;;  %v1107_v50 = vld [vmem:[#allocation16 + $0xc8] sm:$0xff]  ;;  %v1118_v52 = vld [vmem:[#allocation16 + $0x120] sm:$0xff] }
  0xe4   :  { %2533 = vmatprep.subr.bf16.mxu0 %v3235_v49 }
  0xe7   :  { %2535 = vmatpush3.bf16.msra.mxu0 %v2534_v59  ;;  %v763_v59 = vld [vmem:[#allocation13 + $0x80] sm:$0xff] }
  0xe8   :  { %2557 = vmatprep.subr.bf16.mxu0 %v2556_v56  ;;  %v2552_v61 = vpack.c.bf16 %v763_v59, %v758_v58  ;;  %v1094_v56 = vld [vmem:[#allocation16 + $0x60] sm:$0xff]  ;;  %v1105_v58 = vld [vmem:[#allocation16 + $0xb8] sm:$0xff]  ;;  %v2580_v59 = vpack.c.bf16 %v1107_v50, %v1102_v48 }
  0xe9   :  { %v1149_v48 = vld [vmem:[#allocation16 + $0x218] sm:$0xff] }
  0xea   :  { %2401 = vmatmul.mubr.msk.f32.vlgmr.msra.gmra.mrb[2].mxu0 %vm278_vm2, %v2188_v34 }
  0xeb   :  { %932 = vmatprep.mubr.f32.mxu0 %v3237_v55  ;;  %2559 = vmatpush1.bf16.msra.mxu0 %v2558_v57  ;;  %v1099_v57 = vld [vmem:[#allocation16 + $0x88] sm:$0xff] }
 0x1ad   :  { %v2241_v3 = vpop.f32.mrb[0].mxu0 }
 0x1ae   :  { %v2242_v5 = vpop.f32.mrb[1].mxu0 }
 0x1af   :  { %v2276_v6 = vpop.f32.mrb[0].mxu1  ;;  %v2243_v7 = vadd.f32 %v2242_v5, %v2241_v3  ;;  %v759_v3 = vld [vmem:[#allocation13 + $0x60] sm:$0xff]  ;;  %v764_v5 = vld [vmem:[#allocation13 + $0x88] sm:$0xff] }
 0x1b0   :  { %v2277_v8 = vpop.f32.mrb[1].mxu1 }
 0x1b1   :  { %v2278_v9 = vadd.f32 %v2277_v8, %v2276_v6  ;;  %v348_v10 = vadd.f32 %v2243_v7, %v2187_v4  ;;  %v2560_v4 = vpack.c.bf16 %v765_v2, %v760_v1  ;;  %v2562_v6 = vpack.c.bf16 %v764_v5, %v759_v3  ;;  %v1083_v7 = vld [vmem:[#allocation16 + $0x8] sm:$0xff]  ;;  %v1088_v8 = vld [vmem:[#allocation16 + $0x30] sm:$0xff] }
 0x1b2   :  { %v1123_v1 = vld [vmem:[#allocation16 + $0x148] sm:$0xff]  ;;  %v1128_v2 = vld [vmem:[#allocation16 + $0x170] sm:$0xff]  ;;  %v2720_v3 = vpack.c.bf16 %v1099_v57, %v1094_v56 }
 0x1b3   :  { %v418_v11 = vadd.f32 %v2278_v9, %v348_v10  ;;  %2561 = vmatprep.subr.bf16.mxu0 %v2560_v4  ;;  %v2570_v9 = vpack.c.bf16 %v1088_v8, %v1083_v7  ;;  %v1104_v5 = vld [vmem:[#allocation16 + $0xb0] sm:$0xff]  ;;  %v1115_v7 = vld [vmem:[#allocation16 + $0x108] sm:$0xff] }
 0x1b4   :  { %2563 = vmatpush1.bf16.msra.mxu0 %v2562_v6  ;;  %v1109_v6 = vld [vmem:[#allocation16 + $0xd8] sm:$0xff]  ;;  %v1160_v56 = vld [vmem:[#allocation16 + $0x270] sm:$0xff] }
 0x1b5   :  { %2571 = vmatprep.subr.bf16.mxu0 %v2570_v9  ;;  %v1120_v9 = vld [vmem:[#allocation16 + $0x130] sm:$0xff] }
 0x1b6   :  { %v1152_v57 = vld [vmem:[#allocation16 + $0x230] sm:$0xff] }
 0x1bd   :  { %v487_v14 = vpop.f32.mrb[2].mxu0 }
 0x1be   :  { %v488_v15 = vadd.f32 %v487_v14, %v418_v11  ;;  %v2402_v16 = vpop.f32.mrb[3].mxu0 }
 0x1c0   :  { %v491_v18 = vmax.f32 %v488_v15, 0.0 }
 0x1c2   :  { %2412 = vmatmul.mubr.msk.f32.vlgmr.msra.gmra.mrb[2].mxu1 %vm503_vm3, %v491_v18 }
 0x1c3   :  { %2544 = vmatpush3.bf16.msra.mxu1 %v2543_v17  ;;  %2422 = vmatprep.mubr.msk.f32.mxu1 %vm3236_vm1, %v3237_v55  ;;  %v2194_v17 = vld [vmem:[#allocation11] ss:$0 sm:$0xff] }
 0x1c4   :  { %2545 = vmatprep.subr.bf16.mxu1 %v3235_v49 }
 0x1c7   :  { %2547 = vmatpush3.bf16.msra.mxu1 %v2546_v21  ;;  %v1082_v21 = vld [vmem:[#allocation16] sm:$0xff] }
 0x1c8   :  { %2425 = vmatprep.subr.mxu1 %v3237_v55 }
 0x1ca   :  { %2423 = vmatmul.mubr.msk.f32.vlgmr.msra.gmra.mrb[4].mxu1 %vm503_vm3, %v491_v18  ;;  %v751_v18 = vld [vmem:[#allocation13 + $0x20] sm:$0xff] }
 0x1cb   :  { %2427 = vmatprep.mubr.msk.f32.mxu1 %vm3236_vm1, %v3237_v55  ;;  %2426 = vmatpush3.msra.mxu1 %v664_v22  ;;  %v1087_v22 = vld [vmem:[#allocation16 + $0x28] sm:$0xff] }
 0x1cc   :  { %2549 = vmatprep.subr.bf16.mxu1 %v2548_v46  ;;  %v1100_v46 = vld [vmem:[#allocation16 + $0x90] sm:$0xff] }
 0x1cd   :  { %v2718_v54 = vpack.c.bf16 %v1100_v46, %v1095_v43  ;;  %v1147_v43 = vld [vmem:[#allocation16 + $0x208] sm:$0xff] }
 0x295   :  { %v573_v23 = vpop.f32.mrb[2].mxu1 }
 0x296   :  { %v2413_v24 = vpop.f32.mrb[3].mxu1  ;;  %v574_v27 = vadd.f32 %v2190_v25, %v573_v23  ;;  %v1093_v25 = vld [vmem:[#allocation16 + $0x58] sm:$0xff] }
 0x298   :  { %v1040_v31 = vmul.f32 %v574_v27, %v574_v27 }
 0x29d   :  { %v654_v28 = vpop.f32.mrb[4].mxu1 }
 0x29e   :  { %v655_v29 = vadd.f32 %v2192_v26, %v654_v28  ;;  %v2424_v30 = vpop.f32.mrb[5].mxu1  ;;  %v1098_v26 = vld [vmem:[#allocation16 + $0x80] sm:$0xff] }
 0x29f   :  { %v766_v30 = vld [vmem:[#allocation13 + $0x98] sm:$0xff] }
 0x2a0   :  { %v658_v32 = vmul.f32 0.5, %v655_v29  ;;  %v1039_v33 = vadd.f32 1.0, %v655_v29  ;;  %v761_v29 = vld [vmem:[#allocation13 + $0x70] sm:$0xff] }
 0x2a2   :  { %v659_v34 = vmul.f32 1.442695, %v658_v32  ;;  %v1041_v35 = vsub.f32 %v1039_v33, %v1040_v31  ;;  %v1085_v31 = vld [vmem:[#allocation16 + $0x18] sm:$0xff]  ;;  %v2572_v32 = vpack.c.bf16 %v1087_v22, %v1082_v21  ;;  %v1090_v33 = vld [vmem:[#allocation16 + $0x40] sm:$0xff]  ;;  %v1124_v22 = vld [vmem:[#allocation16 + $0x150] sm:$0xff] }
 0x2a4   :  { %2968 = vpow2.f32 %v659_v34  ;;  %v2574_v34 = vpack.c.bf16 %v1098_v26, %v1093_v25  ;;  %v1133_v25 = vld [vmem:[#allocation16 + $0x198] sm:$0xff]  ;;  %v1138_v26 = vld [vmem:[#allocation16 + $0x1c0] sm:$0xff] }
 0x2ae   :  { %v2969_v37 = vpop.eup %2968 }
 0x2af   :  { %v662_v38 = vmul.f32 %v2969_v37, %v661_v36  ;;  %v1042_v39 = vmul.f32 %v2969_v37, %v2969_v37  ;;  %v1097_v36 = vld [vmem:[#allocation16 + $0x78] sm:$0xff]  ;;  %v1103_v37 = vld [vmem:[#allocation16 + $0xa8] sm:$0xff] }
 0x2b1   :  { %v663_v40 = vadd.f32 %v662_v38, %v574_v27  ;;  %v1043_v41 = vsub.f32 %v1041_v35, %v1042_v39  ;;  %v2565_v27 = vpack.c.bf16 %v756_v19, %v751_v18  ;;  %v1092_v35 = vld [vmem:[#allocation16 + $0x50] sm:$0xff]  ;;  %v2568_v39 = vpack.c.bf16 %v766_v30, %v761_v29  ;;  %v1125_v18 = vld [vmem:[#allocation16 + $0x158] sm:$0xff]  ;;  %v1130_v19 = vld [vmem:[#allocation16 + $0x180] sm:$0xff] }
 0x2b2   :  { %v1108_v38 = vld [vmem:[#allocation16 + $0xd0] sm:$0xff]  ;;  %v2576_v44 = vpack.c.bf16 %v1097_v36, %v1092_v35  ;;  %v2730_v21 = vpack.c.bf16 %v1130_v19, %v1125_v18  ;;  %v1139_v35 = vld [vmem:[#allocation16 + $0x1c8] sm:$0xff]  ;;  %v1177_v19 = vld [vmem:[#allocation16 + $0x2f8] sm:$0xff] }
 0x2b3   :  { %2428 = vmatmul.mubr.msk.f32.vlgmr.msra.gmra.mrb[6].mxu1 %vm672_vm4, %v663_v40  ;;  %v1045_v42 = vsel %vm1044_vm5, %v1043_v41, 0.0  ;;  %v2714_v40 = vpack.c.bf16 %v1090_v33, %v1085_v31  ;;  %v1084_v41 = vld [vmem:[#allocation16 + $0x10] sm:$0xff]  ;;  %v2578_v47 = vpack.c.bf16 %v1108_v38, %v1103_v37  ;;  %v1134_v33 = vld [vmem:[#allocation16 + $0x1a0] sm:$0xff]  ;;  %v1143_v37 = vld [vmem:[#allocation16 + $0x1e8] sm:$0xff] }
 0x2b4   :  { %1046 = vadd.xlane.f32.xlu0 %v1045_v42  ;;  %861 = vmatprep.mubr.f32.mxu1 %v3237_v55  ;;  %v1089_v42 = vld [vmem:[#allocation16 + $0x38] sm:$0xff]  ;;  %v1140_v29 = vld [vmem:[#allocation16 + $0x1d0] sm:$0xff]  ;;  %v2736_v36 = vpack.c.bf16 %v1139_v35, %v1134_v33 }
 0x2b5   :  { %2551 = vmatpush1.bf16.msra.mxu1 %v2550_v51  ;;  %v1113_v51 = vld [vmem:[#allocation16 + $0xf8] sm:$0xff]  ;;  %v2716_v53 = vpack.c.bf16 %v1089_v42, %v1084_v41  ;;  %v1132_v31 = vld [vmem:[#allocation16 + $0x190] sm:$0xff]  ;;  %v1150_v41 = vld [vmem:[#allocation16 + $0x220] sm:$0xff] }
 0x2b6   :  { %2553 = vmatprep.subr.bf16.mxu1 %v2552_v61  ;;  %v1110_v61 = vld [vmem:[#allocation16 + $0xe0] sm:$0xff]  ;;  %v2582_v62 = vpack.c.bf16 %v1118_v52, %v1113_v51  ;;  %v1148_v38 = vld [vmem:[#allocation16 + $0x210] sm:$0xff]  ;;  %v1153_v51 = vld [vmem:[#allocation16 + $0x238] sm:$0xff] }
 0x2b7   :  { %v2722_v4 = vpack.c.bf16 %v1110_v61, %v1105_v58  ;;  %v1142_v42 = vld [vmem:[#allocation16 + $0x1e0] sm:$0xff]  ;;  %v1157_v58 = vld [vmem:[#allocation16 + $0x258] sm:$0xff]  ;;  %v1172_v18 = vld [vmem:[#allocation16 + $0x2d0] sm:$0xff] }
 0x2b8   :  { %v2596_v46 = vpack.c.bf16 %v1147_v43, %v1142_v42  ;;  %v1158_v52 = vld [vmem:[#allocation16 + $0x260] sm:$0xff]  ;;  %v2600_v61 = vpack.c.bf16 %v1157_v58, %v1152_v57  ;;  %v1189_v35 = vld [vmem:[#allocation16 + $0x358] sm:$0xff]  ;;  %v1192_v42 = vld [vmem:[#allocation16 + $0x370] sm:$0xff] }
 0x2b9   :  { %2555 = vmatpush1.bf16.msra.mxu1 %v2554_v0  ;;  %v1117_v0 = vld [vmem:[#allocation16 + $0x118] sm:$0xff]  ;;  %v1202_v57 = vld [vmem:[#allocation16 + $0x3c0] sm:$0xff]  ;;  %v1207_v58 = vld [vmem:[#allocation16 + $0x3e8] sm:$0xff] }
 0x2ba   :  { %2564 = vmatprep.subr.bf16.mxu1 %v3235_v49  ;;  %v2584_v8 = vpack.c.bf16 %v1117_v0, %v1112_v63  ;;  %v1159_v63 = vld [vmem:[#allocation16 + $0x268] sm:$0xff]  ;;  %v1197_v43 = vld [vmem:[#allocation16 + $0x398] sm:$0xff] }
 0x341   :  { %v1047_v10 = vpop.xlane.xlu0 %1046 }
 0x342   :  { %v1048_v11 = vrot.slane %v1047_v10, 4 }
 0x344   :  { %v1049_v12 = vadd.f32 %v1048_v11, %v1047_v10  ;;  %v2586_v10 = vpack.c.bf16 %v1128_v2, %v1123_v1  ;;  %v1122_v11 = vld [vmem:[#allocation16 + $0x140] sm:$0xff]  ;;  %v1163_v1 = vld [vmem:[#allocation16 + $0x288] sm:$0xff]  ;;  %v1168_v2 = vld [vmem:[#allocation16 + $0x2b0] sm:$0xff] }
 0x346   :  { %v1050_v13 = vrot.slane %v1049_v12, 2 }
 0x348   :  { %v1051_v14 = vadd.f32 %v1050_v13, %v1049_v12  ;;  %v1127_v12 = vld [vmem:[#allocation16 + $0x168] sm:$0xff]  ;;  %v2724_v13 = vpack.c.bf16 %v1109_v6, %v1104_v5  ;;  %v1170_v5 = vld [vmem:[#allocation16 + $0x2c0] sm:$0xff] }
 0x349   :  { %v1162_v6 = vld [vmem:[#allocation16 + $0x280] sm:$0xff] }
 0x34a   :  { %v1052_v15 = vrot.slane %v1051_v14, 1 }
 0x34c   :  { %v1053_v16 = vadd.f32 %v1052_v15, %v1051_v14  ;;  %v2726_v14 = vpack.c.bf16 %v1120_v9, %v1115_v7  ;;  %v1114_v15 = vld [vmem:[#allocation16 + $0x100] sm:$0xff]  ;;  %v1167_v7 = vld [vmem:[#allocation16 + $0x2a8] sm:$0xff] }
 0x34d   :  { %v2604_v9 = vpack.c.bf16 %v1167_v7, %v1162_v6  ;;  %v1212_v6 = vld [vmem:[#allocation16 + $0x410] sm:$0xff]  ;;  %v1217_v7 = vld [vmem:[#allocation16 + $0x438] sm:$0xff] }
 0x34e   :  { %2946 = vpush %v1053_v16  ;;  %v1119_v16 = vld [vmem:[#allocation16 + $0x128] sm:$0xff] }
 0x37f   :  { %s2947_s5 = spop %2946 }
 0x380   :  { %s1055_s13 = smul.f32 -0.5, %s2947_s5 }
 0x382   :  { %s1056_s24 = smul.f32 0.5, %s1055_s13 }
 0x386   :  { %v742_v20 = vpop.f32.mrb[6].mxu1 }
 0x387   :  { %v743_v23 = vadd.f32 %v2194_v17, %v742_v20  ;;  %v2429_v24 = vpop.f32.mrb[7].mxu1  ;;  %v2588_v17 = vpack.c.bf16 %v1127_v12, %v1122_v11  ;;  %v2728_v20 = vpack.c.bf16 %v1119_v16, %v1114_v15  ;;  %v1169_v11 = vld [vmem:[#allocation16 + $0x2b8] sm:$0xff]  ;;  %v1175_v15 = vld [vmem:[#allocation16 + $0x2e8] sm:$0xff] }
 0x389   :  { %v746_v28 = vmax.f32 %v743_v23, 0.0  ;;  %v1129_v23 = vld [vmem:[#allocation16 + $0x178] sm:$0xff] }
 0x38a   :  { %v2732_v24 = vpack.c.bf16 %v1129_v23, %v1124_v22  ;;  %v1174_v22 = vld [vmem:[#allocation16 + $0x2e0] sm:$0xff]  ;;  %v1179_v23 = vld [vmem:[#allocation16 + $0x308] sm:$0xff] }
 0x38b   :  { %2196 = vmatmul.mubr.msk.f32.vlgmr.msra.gmra.mrb[8].mxu1 %vm503_vm3, %v746_v28  ;;  %2197 = vmatmul.mubr.msk.f32.vlgmr.msra.gmra.mrb[4].mxu0 %vm503_vm3, %v746_v28 }
 0x38c   :  { %2566 = vmatpush3.bf16.msra.mxu1 %v2565_v27  ;;  %2438 = vmatprep.mubr.msk.f32.mxu1 %vm3236_vm1, %v3237_v55  ;;  %v1135_v27 = vld [vmem:[#allocation16 + $0x1a8] sm:$0xff] }
 0x38d   :  { %2567 = vmatprep.subr.bf16.mxu1 %v3235_v49  ;;  %2573 = vmatpush1.bf16.msra.mxu0 %v2572_v32  ;;  %v2734_v30 = vpack.c.bf16 %v1140_v29, %v1135_v27  ;;  %v1137_v32 = vld [vmem:[#allocation16 + $0x1b8] sm:$0xff]  ;;  %v1190_v29 = vld [vmem:[#allocation16 + $0x360] sm:$0xff] }
 0x38e   :  { %2575 = vmatprep.subr.bf16.mxu0 %v2574_v34  ;;  %v2592_v34 = vpack.c.bf16 %v1137_v32, %v1132_v31  ;;  %v1185_v27 = vld [vmem:[#allocation16 + $0x338] sm:$0xff]  ;;  %v1187_v31 = vld [vmem:[#allocation16 + $0x348] sm:$0xff] }
 0x38f   :  { %v2754_v32 = vpack.c.bf16 %v1190_v29, %v1185_v27  ;;  %v1235_v27 = vld [vmem:[#allocation16 + $0x4c8] sm:$0xff]  ;;  %v1240_v29 = vld [vmem:[#allocation16 + $0x4f0] sm:$0xff] }
 0x390   :  { %2569 = vmatpush3.bf16.msra.mxu1 %v2568_v39  ;;  %v1145_v39 = vld [vmem:[#allocation16 + $0x1f8] sm:$0xff] }
 0x391   :  { %2715 = vmatprep.subr.bf16.mxu1 %v2714_v40  ;;  %2577 = vmatpush1.bf16.msra.mxu0 %v2576_v44  ;;  %v2594_v40 = vpack.c.bf16 %v1148_v38, %v1143_v37  ;;  %v2738_v44 = vpack.c.bf16 %v1150_v41, %v1145_v39  ;;  %v1193_v37 = vld [vmem:[#allocation16 + $0x378] sm:$0xff]  ;;  %v1198_v38 = vld [vmem:[#allocation16 + $0x3a0] sm:$0xff]  ;;  %v1195_v39 = vld [vmem:[#allocation16 + $0x388] sm:$0xff] }
 0x392   :  { %2579 = vmatprep.subr.bf16.mxu0 %v2578_v47  ;;  %v1144_v47 = vld [vmem:[#allocation16 + $0x1f0] sm:$0xff] }
 0x393   :  { %2439 = vmatmul.mubr.msk.f32.vlgmr.msra.gmra.mrb[10].mxu1 %vm503_vm3, %v746_v28  ;;  %v2590_v28 = vpack.c.bf16 %v1138_v26, %v1133_v25  ;;  %v2740_v50 = vpack.c.bf16 %v1149_v48, %v1144_v47  ;;  %v1183_v25 = vld [vmem:[#allocation16 + $0x328] sm:$0xff]  ;;  %v1188_v26 = vld [vmem:[#allocation16 + $0x350] sm:$0xff]  ;;  %v1194_v47 = vld [vmem:[#allocation16 + $0x380] sm:$0xff] }
 0x394   :  { %2717 = vmatpush1.bf16.msra.mxu1 %v2716_v53  ;;  %v1155_v53 = vld [vmem:[#allocation16 + $0x248] sm:$0xff]  ;;  %v1200_v41 = vld [vmem:[#allocation16 + $0x3b0] sm:$0xff] }
 0x395   :  { %2719 = vmatprep.subr.bf16.mxu1 %v2718_v54  ;;  %2581 = vmatpush1.bf16.msra.mxu0 %v2580_v59  ;;  %v2598_v54 = vpack.c.bf16 %v1158_v52, %v1153_v51  ;;  %v2742_v59 = vpack.c.bf16 %v1160_v56, %v1155_v53  ;;  %v1199_v48 = vld [vmem:[#allocation16 + $0x3a8] sm:$0xff]  ;;  %v1208_v52 = vld [vmem:[#allocation16 + $0x3f0] sm:$0xff]  ;;  %v1205_v53 = vld [vmem:[#allocation16 + $0x3d8] sm:$0xff] }
 0x396   :  { %2583 = vmatprep.subr.bf16.mxu0 %v2582_v62  ;;  %v1154_v62 = vld [vmem:[#allocation16 + $0x240] sm:$0xff]  ;;  %v1203_v51 = vld [vmem:[#allocation16 + $0x3c8] sm:$0xff] }
 0x397   :  { %v2744_v0 = vpack.c.bf16 %v1159_v63, %v1154_v62  ;;  %v1210_v56 = vld [vmem:[#allocation16 + $0x400] sm:$0xff]  ;;  %v1204_v62 = vld [vmem:[#allocation16 + $0x3d0] sm:$0xff]  ;;  %v1209_v63 = vld [vmem:[#allocation16 + $0x3f8] sm:$0xff] }
 0x398   :  { %2721 = vmatpush1.bf16.msra.mxu1 %v2720_v3  ;;  %v1165_v3 = vld [vmem:[#allocation16 + $0x298] sm:$0xff] }
 0x399   :  { %2723 = vmatprep.subr.bf16.mxu1 %v2722_v4  ;;  %2585 = vmatpush1.bf16.msra.mxu0 %v2584_v8  ;;  %v2602_v4 = vpack.c.bf16 %v1168_v2, %v1163_v1  ;;  %v2746_v8 = vpack.c.bf16 %v1170_v5, %v1165_v3  ;;  %v1213_v1 = vld [vmem:[#allocation16 + $0x418] sm:$0xff]  ;;  %v1218_v2 = vld [vmem:[#allocation16 + $0x440] sm:$0xff]  ;;  %v1215_v3 = vld [vmem:[#allocation16 + $0x428] sm:$0xff] }
 0x39a   :  { %2587 = vmatprep.subr.bf16.mxu0 %v2586_v10  ;;  %v1164_v10 = vld [vmem:[#allocation16 + $0x290] sm:$0xff] }
 0x39b   :  { %v2748_v12 = vpack.c.bf16 %v1169_v11, %v1164_v10  ;;  %v1220_v5 = vld [vmem:[#allocation16 + $0x450] sm:$0xff]  ;;  %v1214_v10 = vld [vmem:[#allocation16 + $0x420] sm:$0xff]  ;;  %v1219_v11 = vld [vmem:[#allocation16 + $0x448] sm:$0xff] }
 0x39c   :  { %2725 = vmatpush1.bf16.msra.mxu1 %v2724_v13  ;;  %v1173_v13 = vld [vmem:[#allocation16 + $0x2d8] sm:$0xff] }
 0x39d   :  { %2727 = vmatprep.subr.bf16.mxu1 %v2726_v14  ;;  %2589 = vmatpush1.bf16.msra.mxu0 %v2588_v17  ;;  %v1178_v14 = vld [vmem:[#allocation16 + $0x300] sm:$0xff]  ;;  %v1180_v17 = vld [vmem:[#allocation16 + $0x310] sm:$0xff] }
 0x39e   :  { %2591 = vmatprep.subr.bf16.mxu0 %v2590_v28  ;;  %v2606_v16 = vpack.c.bf16 %v1178_v14, %v1173_v13  ;;  %v2610_v28 = vpack.c.bf16 %v1188_v26, %v1183_v25  ;;  %v1223_v13 = vld [vmem:[#allocation16 + $0x468] sm:$0xff]  ;;  %v1228_v14 = vld [vmem:[#allocation16 + $0x490] sm:$0xff]  ;;  %v1233_v25 = vld [vmem:[#allocation16 + $0x4b8] sm:$0xff] }
 0x39f   :  { %v1238_v26 = vld [vmem:[#allocation16 + $0x4e0] sm:$0xff] }
 0x3a0   :  { %2729 = vmatpush1.bf16.msra.mxu1 %v2728_v20  ;;  %v2750_v20 = vpack.c.bf16 %v1180_v17, %v1175_v15  ;;  %v1225_v15 = vld [vmem:[#allocation16 + $0x478] sm:$0xff]  ;;  %v1230_v17 = vld [vmem:[#allocation16 + $0x4a0] sm:$0xff] }
 0x3a1   :  { %2731 = vmatprep.subr.bf16.mxu1 %v2730_v21  ;;  %2593 = vmatpush1.bf16.msra.mxu0 %v2592_v34  ;;  %v2608_v21 = vpack.c.bf16 %v1177_v19, %v1172_v18  ;;  %v1184_v34 = vld [vmem:[#allocation16 + $0x330] sm:$0xff]  ;;  %v1222_v18 = vld [vmem:[#allocation16 + $0x460] sm:$0xff]  ;;  %v1227_v19 = vld [vmem:[#allocation16 + $0x488] sm:$0xff] }
 0x3a2   :  { %2595 = vmatprep.subr.bf16.mxu0 %v2594_v40  ;;  %v2614_v40 = vpack.c.bf16 %v1198_v38, %v1193_v37  ;;  %v1243_v37 = vld [vmem:[#allocation16 + $0x508] sm:$0xff]  ;;  %v1248_v38 = vld [vmem:[#allocation16 + $0x530] sm:$0xff] }
 0x3a4   :  { %2733 = vmatpush1.bf16.msra.mxu1 %v2732_v24  ;;  %v2752_v24 = vpack.c.bf16 %v1179_v23, %v1174_v22  ;;  %v1224_v22 = vld [vmem:[#allocation16 + $0x470] sm:$0xff]  ;;  %v1229_v23 = vld [vmem:[#allocation16 + $0x498] sm:$0xff] }
 0x3a5   :  { %2735 = vmatprep.subr.bf16.mxu1 %v2734_v30  ;;  %2597 = vmatpush1.bf16.msra.mxu0 %v2596_v46  ;;  %v1182_v30 = vld [vmem:[#allocation16 + $0x320] sm:$0xff]  ;;  %v2616_v46 = vpack.c.bf16 %v1197_v43, %v1192_v42  ;;  %v771_v43 = vsub.s32 0, %v3558_v60 }
 0x3a6   :  { %2599 = vmatprep.subr.bf16.mxu0 %v2598_v54  ;;  %v2612_v33 = vpack.c.bf16 %v1187_v31, %v1182_v30  ;;  %v2618_v54 = vpack.c.bf16 %v1208_v52, %v1203_v51  ;;  %v1232_v30 = vld [vmem:[#allocation16 + $0x4b0] sm:$0xff]  ;;  %v1237_v31 = vld [vmem:[#allocation16 + $0x4d8] sm:$0xff] }
 0x3a8   :  { %2737 = vmatpush1.bf16.msra.mxu1 %v2736_v36  ;;  %v2756_v36 = vpack.c.bf16 %v1189_v35, %v1184_v34  ;;  %v1234_v34 = vld [vmem:[#allocation16 + $0x4c0] sm:$0xff]  ;;  %v1239_v35 = vld [vmem:[#allocation16 + $0x4e8] sm:$0xff] }
 0x3a9   :  { %2739 = vmatprep.subr.bf16.mxu1 %v2738_v44  ;;  %2601 = vmatpush1.bf16.msra.mxu0 %v2600_v61  ;;  %v2758_v44 = vpack.c.bf16 %v1200_v41, %v1195_v39  ;;  %v2620_v61 = vpack.c.bf16 %v1207_v58, %v1202_v57  ;;  %v1245_v39 = vld [vmem:[#allocation16 + $0x518] sm:$0xff]  ;;  %v1250_v41 = vld [vmem:[#allocation16 + $0x540] sm:$0xff] }
 0x3aa   :  { %2603 = vmatprep.subr.bf16.mxu0 %v2602_v4  ;;  %v2622_v4 = vpack.c.bf16 %v1218_v2, %v1213_v1  ;;  %v2778_v42 = vpack.c.bf16 %v1250_v41, %v1245_v39 }
 0x3ac   :  { %2741 = vmatpush1.bf16.msra.mxu1 %v2740_v50  ;;  %v2760_v50 = vpack.c.bf16 %v1199_v48, %v1194_v47  ;;  %v775_v47 = vsub.s32 1, %v3558_v60  ;;  %v783_v48 = vsub.s32 3, %v3558_v60 }
 0x3ad   :  { %2743 = vmatprep.subr.bf16.mxu1 %v2742_v59  ;;  %2605 = vmatpush1.bf16.msra.mxu0 %v2604_v9  ;;  %v2762_v59 = vpack.c.bf16 %v1210_v56, %v1205_v53  ;;  %v2624_v9 = vpack.c.bf16 %v1217_v7, %v1212_v6 }
 0x3ae   :  { %2607 = vmatprep.subr.bf16.mxu0 %v2606_v16  ;;  %v2626_v16 = vpack.c.bf16 %v1228_v14, %v1223_v13 }
 0x3b0   :  { %2745 = vmatpush1.bf16.msra.mxu1 %v2744_v0  ;;  %v2764_v0 = vpack.c.bf16 %v1209_v63, %v1204_v62  ;;  %v787_v62 = vsub.s32 4, %v3558_v60 }
 0x3b1   :  { %2747 = vmatprep.subr.bf16.mxu1 %v2746_v8  ;;  %2609 = vmatpush1.bf16.msra.mxu0 %v2608_v21  ;;  %v2766_v8 = vpack.c.bf16 %v1220_v5, %v1215_v3  ;;  %v2628_v21 = vpack.c.bf16 %v1227_v19, %v1222_v18 }
 0x3b2   :  { %2611 = vmatprep.subr.bf16.mxu0 %v2610_v28  ;;  %v2630_v28 = vpack.c.bf16 %v1238_v26, %v1233_v25 }
 0x3b4   :  { %2749 = vmatpush1.bf16.msra.mxu1 %v2748_v12  ;;  %v2768_v12 = vpack.c.bf16 %v1219_v11, %v1214_v10 }
 0x3b5   :  { %2751 = vmatprep.subr.bf16.mxu1 %v2750_v20  ;;  %2613 = vmatpush1.bf16.msra.mxu0 %v2612_v33  ;;  %v2770_v20 = vpack.c.bf16 %v1230_v17, %v1225_v15  ;;  %v2632_v33 = vpack.c.bf16 %v1237_v31, %v1232_v30  ;;  %v1242_v30 = vld [vmem:[#allocation16 + $0x500] sm:$0xff]  ;;  %v1247_v31 = vld [vmem:[#allocation16 + $0x528] sm:$0xff] }
 0x3b6   :  { %2615 = vmatprep.subr.bf16.mxu0 %v2614_v40  ;;  %v2634_v40 = vpack.c.bf16 %v1248_v38, %v1243_v37  ;;  %v1255_v37 = vld [vmem:[#allocation16 + $0x568] sm:$0xff]  ;;  %v1260_v38 = vld [vmem:[#allocation16 + $0x590] sm:$0xff] }
 0x3b8   :  { %2753 = vmatpush1.bf16.msra.mxu1 %v2752_v24  ;;  %v2772_v24 = vpack.c.bf16 %v1229_v23, %v1224_v22 }
 0x3b9   :  { %2755 = vmatprep.subr.bf16.mxu1 %v2754_v32  ;;  %2617 = vmatpush1.bf16.msra.mxu0 %v2616_v46  ;;  %v2774_v32 = vpack.c.bf16 %v1240_v29, %v1235_v27  ;;  %v767_v46 = vld [vmem:[#allocation14] sm:$0x1f] }
 0x3ba   :  { %2619 = vmatprep.subr.bf16.mxu0 %v2618_v54  ;;  %v776_v52 = vrot.slane %v767_v46, %v775_v47  ;;  %v784_v53 = vrot.slane %v767_v46, %v783_v48  ;;  %v788_v5 = vrot.slane %v767_v46, %v787_v62 }
 0x3bc   :  { %2757 = vmatpush1.bf16.msra.mxu1 %v2756_v36  ;;  %v2776_v36 = vpack.c.bf16 %v1239_v35, %v1234_v34  ;;  %v1253_v34 = vld [vmem:[#allocation16 + $0x558] sm:$0xff]  ;;  %v1258_v35 = vld [vmem:[#allocation16 + $0x580] sm:$0xff] }
 0x3bd   :  { %2759 = vmatprep.subr.bf16.mxu1 %v2758_v44  ;;  %2621 = vmatpush1.bf16.msra.mxu0 %v2620_v61  ;;  %v779_v44 = vsub.s32 2, %v3558_v60 }
 0x3be   :  { %2623 = vmatprep.subr.bf16.mxu0 %v2622_v4 }
 0x3bf   :  { %v780_v51 = vrot.slane %v767_v46, %v779_v44 }
 0x3c0   :  { %2761 = vmatpush1.bf16.msra.mxu1 %v2760_v50  ;;  %v772_v50 = vrot.slane %v767_v46, %v771_v43  ;;  %v1252_v46 = vld [vmem:[#allocation16 + $0x550] sm:$0xff] }
 0x3c1   :  { %2763 = vmatprep.subr.bf16.mxu1 %v2762_v59  ;;  %2625 = vmatpush1.bf16.msra.mxu0 %v2624_v9 }
 0x3c2   :  { %2627 = vmatprep.subr.bf16.mxu0 %v2626_v16 }
 0x3c4   :  { %2765 = vmatpush1.bf16.msra.mxu1 %v2764_v0 }
 0x3c5   :  { %2767 = vmatprep.subr.bf16.mxu1 %v2766_v8  ;;  %2629 = vmatpush1.bf16.msra.mxu0 %v2628_v21 }
 0x3c6   :  { %2631 = vmatprep.subr.bf16.mxu0 %v2630_v28 }
 0x3c8   :  { %2769 = vmatpush1.bf16.msra.mxu1 %v2768_v12 }
 0x3c9   :  { %2771 = vmatprep.subr.bf16.mxu1 %v2770_v20  ;;  %2633 = vmatpush1.bf16.msra.mxu0 %v2632_v33  ;;  %v1249_v33 = vld [vmem:[#allocation16 + $0x538] sm:$0xff] }
 0x3ca   :  { %2635 = vmatprep.subr.bf16.mxu0 %v2634_v40  ;;  %v2636_v40 = vpack.c.bf16 %v1247_v31, %v1242_v30  ;;  %v1289_v30 = vld [vmem:[#allocation16 + $0x678] sm:$0xff] }
 0x3cb   :  { %v1293_v31 = vld [vmem:[#allocation16 + $0x698] sm:$0xff] }
 0x3cc   :  { %2773 = vmatpush1.bf16.msra.mxu1 %v2772_v24 }
 0x3cd   :  { %2775 = vmatprep.subr.bf16.mxu1 %v2774_v32  ;;  %v1244_v32 = vld [vmem:[#allocation16 + $0x510] sm:$0xff] }
 0x3ce   :  { %v2780_v41 = vpack.c.bf16 %v1249_v33, %v1244_v32  ;;  %v1298_v32 = vld [vmem:[#allocation16 + $0x6c0] sm:$0xff]  ;;  %v1295_v33 = vld [vmem:[#allocation16 + $0x6a8] sm:$0xff] }
 0x3d0   :  { %2777 = vmatpush1.bf16.msra.mxu1 %v2776_v36 }
 0x3d1   :  { %2779 = vmatprep.subr.bf16.mxu1 %v2778_v42 }
 0x45e   :  { %v863_v54 = vpop.f32.mrb[8].mxu1  ;;  %v934_v56 = vpop.f32.mrb[4].mxu0 }
 0x45f   :  { %v864_v57 = vadd.f32 %v863_v54, %v772_v50  ;;  %v935_v58 = vadd.f32 %v934_v56, %v780_v51  ;;  %v865_v59 = vpop.f32.mrb[9].mxu1  ;;  %v936_v61 = vpop.f32.mrb[5].mxu0  ;;  %v1257_v50 = vld [vmem:[#allocation16 + $0x578] sm:$0xff]  ;;  %v1254_v51 = vld [vmem:[#allocation16 + $0x560] sm:$0xff]  ;;  %v2638_v54 = vpack.c.bf16 %v1258_v35, %v1253_v34  ;;  %v2782_v56 = vpack.c.bf16 %v1260_v38, %v1255_v37  ;;  %v1300_v34 = vld [vmem:[#allocation16 + $0x6d0] sm:$0xff] }
 0x460   :  { %v866_v63 = vadd.f32 %v865_v59, %v776_v52  ;;  %v937_v0 = vadd.f32 %v936_v61, %v784_v53  ;;  %v1259_v52 = vld [vmem:[#allocation16 + $0x588] sm:$0xff]  ;;  %v1270_v59 = vld [vmem:[#allocation16 + $0x5e0] sm:$0xff]  ;;  %v1292_v38 = vld [vmem:[#allocation16 + $0x690] sm:$0xff] }
 0x461   :  { %v2199_v1 = vmul.f32 -1.442695, %v864_v57  ;;  %v2201_v2 = vmul.f32 -1.442695, %v935_v58  ;;  %v1263_v53 = vld [vmem:[#allocation16 + $0x5a8] sm:$0xff]  ;;  %v1268_v57 = vld [vmem:[#allocation16 + $0x5d0] sm:$0xff] }
 0x462   :  { %v2200_v3 = vmul.f32 -1.442695, %v866_v63  ;;  %v2202_v4 = vmul.f32 -1.442695, %v937_v0  ;;  %v1265_v58 = vld [vmem:[#allocation16 + $0x5b8] sm:$0xff]  ;;  %v2640_v63 = vpack.c.bf16 %v1257_v50, %v1252_v46  ;;  %v2784_v0 = vpack.c.bf16 %v1259_v52, %v1254_v51  ;;  %v1294_v50 = vld [vmem:[#allocation16 + $0x6a0] sm:$0xff] }
 0x463   :  { %2970 = vpow2.f32 %v2199_v1  ;;  %v1262_v1 = vld [vmem:[#allocation16 + $0x5a0] sm:$0xff]  ;;  %v2798_v46 = vpack.c.bf16 %v1300_v34, %v1295_v33  ;;  %v1299_v51 = vld [vmem:[#allocation16 + $0x6c8] sm:$0xff]  ;;  %v1332_v34 = vld [vmem:[#allocation16 + $0x7d0] sm:$0xff] }
 0x464   :  { %2972 = vpow2.f32 %v2201_v2  ;;  %v1267_v2 = vld [vmem:[#allocation16 + $0x5c8] sm:$0xff] }
 0x465   :  { %2974 = vpow2.f32 %v2200_v3  ;;  %v2642_v3 = vpack.c.bf16 %v1268_v57, %v1263_v53  ;;  %v1303_v52 = vld [vmem:[#allocation16 + $0x6e8] sm:$0xff]  ;;  %v1308_v53 = vld [vmem:[#allocation16 + $0x710] sm:$0xff] }
 0x466   :  { %2976 = vpow2.f32 %v2202_v4  ;;  %v1005_v6 = vpop.f32.mrb[10].mxu1  ;;  %v2786_v4 = vpack.c.bf16 %v1270_v59, %v1265_v58  ;;  %v2800_v58 = vpack.c.bf16 %v1299_v51, %v1294_v50  ;;  %v1302_v59 = vld [vmem:[#allocation16 + $0x6e0] sm:$0xff]  ;;  %v1348_v50 = vld [vmem:[#allocation16 + $0x850] sm:$0xff]  ;;  %v1345_v51 = vld [vmem:[#allocation16 + $0x838] sm:$0xff] }
 0x467   :  { %v1006_v7 = vadd.f32 %v1005_v6, %v788_v5  ;;  %v2440_v8 = vpop.f32.mrb[11].mxu1  ;;  %v1264_v5 = vld [vmem:[#allocation16 + $0x5b0] sm:$0xff]  ;;  %v1269_v6 = vld [vmem:[#allocation16 + $0x5d8] sm:$0xff] }
 0x468   :  { %v1278_v8 = vld [vmem:[#allocation16 + $0x620] sm:$0xff] }
 0x469   :  { %v2203_v9 = vmul.f32 -1.442695, %v1006_v7  ;;  %v1273_v7 = vld [vmem:[#allocation16 + $0x5f8] sm:$0xff] }
 0x46b   :  { %2978 = vpow2.f32 %v2203_v9  ;;  %v1275_v9 = vld [vmem:[#allocation16 + $0x608] sm:$0xff] }
 0x46d   :  { %v2971_v10 = vpop.eup %2970 }
 0x46e   :  { %v2973_v11 = vpop.eup %2972  ;;  %v1024_v12 = vadd.f32 1.0, %v2971_v10  ;;  %v1280_v10 = vld [vmem:[#allocation16 + $0x630] sm:$0xff] }
 0x46f   :  { %v2975_v13 = vpop.eup %2974  ;;  %v1026_v14 = vadd.f32 1.0, %v2973_v11  ;;  %v2644_v11 = vpack.c.bf16 %v1267_v2, %v1262_v1  ;;  %v1304_v2 = vld [vmem:[#allocation16 + $0x6f0] sm:$0xff] }
 0x470   :  { %v2977_v15 = vpop.eup %2976  ;;  %2980 = vrcp.f32 %v1024_v12  ;;  %v1025_v16 = vadd.f32 1.0, %v2975_v13  ;;  %v2788_v12 = vpack.c.bf16 %v1269_v6, %v1264_v5  ;;  %v1272_v13 = vld [vmem:[#allocation16 + $0x5f0] sm:$0xff]  ;;  %v1318_v5 = vld [vmem:[#allocation16 + $0x760] sm:$0xff]  ;;  %v1315_v6 = vld [vmem:[#allocation16 + $0x748] sm:$0xff] }
 0x471   :  { %2982 = vrcp.f32 %v1026_v14  ;;  %v1027_v17 = vadd.f32 1.0, %v2977_v15  ;;  %v1277_v14 = vld [vmem:[#allocation16 + $0x618] sm:$0xff]  ;;  %v2646_v15 = vpack.c.bf16 %v1278_v8, %v1273_v7  ;;  %v1320_v7 = vld [vmem:[#allocation16 + $0x770] sm:$0xff] }
 0x472   :  { %2984 = vrcp.f32 %v1025_v16  ;;  %v2790_v16 = vpack.c.bf16 %v1280_v10, %v1275_v9  ;;  %v1312_v10 = vld [vmem:[#allocation16 + $0x730] sm:$0xff] }
 0x473   :  { %2986 = vrcp.f32 %v1027_v17  ;;  %v1274_v17 = vld [vmem:[#allocation16 + $0x600] sm:$0xff] }
 0x475   :  { %v2979_v18 = vpop.eup %2978 }
 0x476   :  { %v1028_v19 = vadd.f32 1.0, %v2979_v18  ;;  %v1279_v18 = vld [vmem:[#allocation16 + $0x628] sm:$0xff] }
 0x478   :  { %2988 = vrcp.f32 %v1028_v19  ;;  %v1283_v19 = vld [vmem:[#allocation16 + $0x648] sm:$0xff] }
 0x47a   :  { %v2981_v20 = vpop.eup %2980 }
 0x47b   :  { %v2983_v21 = vpop.eup %2982 }
 0x47c   :  { %v2985_v22 = vpop.eup %2984 }
 0x47d   :  { %v2987_v23 = vpop.eup %2986  ;;  %v1067_v24 = vcombine.low %v2981_v20, %v2985_v22  ;;  %v1288_v20 = vld [vmem:[#allocation16 + $0x670] sm:$0xff]  ;;  %v1290_v22 = vld [vmem:[#allocation16 + $0x680] sm:$0xff] }
 0x47e   :  { %v1068_v25 = vcombine.low %v2983_v21, %v2987_v23  ;;  %v1285_v21 = vld [vmem:[#allocation16 + $0x658] sm:$0xff]  ;;  %v2648_v23 = vpack.c.bf16 %v1277_v14, %v1272_v13  ;;  %v2806_v13 = vpack.c.bf16 %v1320_v7, %v1315_v6  ;;  %v1314_v14 = vld [vmem:[#allocation16 + $0x740] sm:$0xff]  ;;  %v1352_v7 = vld [vmem:[#allocation16 + $0x870] sm:$0xff] }
 0x47f   :  { %v1069_v26 = vrot.slane %v1067_v24, 6  ;;  %v2792_v24 = vpack.c.bf16 %v1279_v18, %v1274_v17  ;;  %v1328_v17 = vld [vmem:[#allocation16 + $0x7b0] sm:$0xff]  ;;  %v1325_v18 = vld [vmem:[#allocation16 + $0x798] sm:$0xff] }
 0x480   :  { %v1070_v27 = vrot.slane %v1068_v25, 6  ;;  %v1282_v25 = vld [vmem:[#allocation16 + $0x640] sm:$0xff] }
 0x481   :  { %1075 = vst [vmem:[#allocation2] sm:$0xcc] %v1069_v26  ;;  %v1287_v26 = vld [vmem:[#allocation16 + $0x668] sm:$0xff] }
 0x482   :  { %v2989_v28 = vpop.eup %2988  ;;  %1076 = vst [vmem:[#allocation2 + $0x8] sm:$0xcc] %v1070_v27  ;;  %v2650_v27 = vpack.c.bf16 %v1288_v20, %v1283_v19  ;;  %v2652_v35 = vpack.c.bf16 %v1287_v26, %v1282_v25  ;;  %v1330_v19 = vld [vmem:[#allocation16 + $0x7c0] sm:$0xff]  ;;  %v1324_v26 = vld [vmem:[#allocation16 + $0x790] sm:$0xff] }
 0x483   :  { %v1071_v29 = vrot.slane %v2989_v28, 6  ;;  %v2794_v28 = vpack.c.bf16 %v1290_v22, %v1285_v21  ;;  %v1322_v22 = vld [vmem:[#allocation16 + $0x780] sm:$0xff]  ;;  %v2810_v25 = vpack.c.bf16 %v1330_v19, %v1325_v18 }
 0x484   :  { %v1362_v19 = vld [vmem:[#allocation16 + $0x8c0] sm:$0xff] }
 0x485   :  { %1078 = vst.msk [vmem:[#allocation2 + $0x10] sm:$0xc] %vm1077_vm6, %v1071_v29  ;;  %v1284_v29 = vld [vmem:[#allocation16 + $0x650] sm:$0xff] }
 0x486   :  { %v2796_v37 = vpack.c.bf16 %v1289_v30, %v1284_v29  ;;  %v1338_v29 = vld [vmem:[#allocation16 + $0x800] sm:$0xff]  ;;  %v1335_v30 = vld [vmem:[#allocation16 + $0x7e8] sm:$0xff] }
 0x488   :  { %v3735_v36 = vld [vmem:[#allocation2] sm:$0xff] }
 0x489   :  { %v3739_v39 = vcombine.high %v3735_v36, %v3735_v36  ;;  %v3741_v42 = vld [vmem:[#allocation2 + $0x8] sm:$0xff] }
 0x48a   :  { %v3749_v61 = vcombine.high %v3741_v42, %v3741_v42 }
 0x48b   :  { %1542 = vmatprep.mubr.f32.mxu0 %v3739_v39  ;;  %1755 = vmatprep.mubr.f32.mxu1 %v3739_v39 }
 0x48c   :  { %1543 = vmatmul.mubr.f32.vlgmr.msra.gmra.mrb[6].mxu0 %v3735_v36  ;;  %1756 = vmatmul.mubr.f32.vlgmr.msra.gmra.mrb[12].mxu1 %v3735_v36 }
 0x48d   :  { %2637 = vmatpush1.bf16.msra.mxu0 %v2636_v40  ;;  %2781 = vmatpush1.bf16.msra.mxu1 %v2780_v41  ;;  %v1297_v40 = vld [vmem:[#allocation16 + $0x6b8] sm:$0xff]  ;;  %v2654_v41 = vpack.c.bf16 %v1298_v32, %v1293_v31  ;;  %v1340_v31 = vld [vmem:[#allocation16 + $0x810] sm:$0xff] }
 0x48e   :  { %1613 = vmatprep.mubr.f32.mxu0 %v3749_v61  ;;  %1826 = vmatprep.mubr.f32.mxu1 %v3749_v61  ;;  %v2656_v57 = vpack.c.bf16 %v1297_v40, %v1292_v38  ;;  %v2814_v38 = vpack.c.bf16 %v1340_v31, %v1335_v30  ;;  %v1334_v40 = vld [vmem:[#allocation16 + $0x7e0] sm:$0xff]  ;;  %v1372_v31 = vld [vmem:[#allocation16 + $0x910] sm:$0xff] }
 0x48f   :  { %2639 = vmatprep.subr.bf16.mxu0 %v2638_v54  ;;  %2783 = vmatprep.subr.bf16.mxu1 %v2782_v56  ;;  %v1305_v54 = vld [vmem:[#allocation16 + $0x6f8] sm:$0xff]  ;;  %v1310_v56 = vld [vmem:[#allocation16 + $0x720] sm:$0xff] }
 0x490   :  { %v2802_v1 = vpack.c.bf16 %v1310_v56, %v1305_v54  ;;  %v1342_v56 = vld [vmem:[#allocation16 + $0x820] sm:$0xff] }
 0x491   :  { %2641 = vmatpush1.bf16.msra.mxu0 %v2640_v63  ;;  %2785 = vmatpush1.bf16.msra.mxu1 %v2784_v0  ;;  %v1307_v63 = vld [vmem:[#allocation16 + $0x708] sm:$0xff]  ;;  %v2658_v0 = vpack.c.bf16 %v1308_v53, %v1303_v52  ;;  %v1350_v52 = vld [vmem:[#allocation16 + $0x860] sm:$0xff] }
 0x492   :  { %2643 = vmatprep.subr.bf16.mxu0 %v2642_v3  ;;  %2787 = vmatprep.subr.bf16.mxu1 %v2786_v4  ;;  %v1309_v3 = vld [vmem:[#allocation16 + $0x718] sm:$0xff]  ;;  %v2660_v8 = vpack.c.bf16 %v1307_v63, %v1302_v59  ;;  %v2818_v59 = vpack.c.bf16 %v1350_v52, %v1345_v51  ;;  %v1344_v63 = vld [vmem:[#allocation16 + $0x830] sm:$0xff]  ;;  %v1382_v52 = vld [vmem:[#allocation16 + $0x960] sm:$0xff] }
 0x493   :  { %v1313_v4 = vld [vmem:[#allocation16 + $0x738] sm:$0xff]  ;;  %v2804_v9 = vpack.c.bf16 %v1309_v3, %v1304_v2  ;;  %v1358_v2 = vld [vmem:[#allocation16 + $0x8a0] sm:$0xff]  ;;  %v1355_v3 = vld [vmem:[#allocation16 + $0x888] sm:$0xff] }
 0x495   :  { %2645 = vmatpush1.bf16.msra.mxu0 %v2644_v11  ;;  %2789 = vmatpush1.bf16.msra.mxu1 %v2788_v12  ;;  %v1317_v11 = vld [vmem:[#allocation16 + $0x758] sm:$0xff]  ;;  %v2662_v12 = vpack.c.bf16 %v1318_v5, %v1313_v4  ;;  %v1360_v4 = vld [vmem:[#allocation16 + $0x8b0] sm:$0xff] }
 0x496   :  { %2647 = vmatprep.subr.bf16.mxu0 %v2646_v15  ;;  %2791 = vmatprep.subr.bf16.mxu1 %v2790_v16  ;;  %v1319_v15 = vld [vmem:[#allocation16 + $0x768] sm:$0xff]  ;;  %v2664_v20 = vpack.c.bf16 %v1317_v11, %v1312_v10  ;;  %v2822_v10 = vpack.c.bf16 %v1360_v4, %v1355_v3  ;;  %v1354_v11 = vld [vmem:[#allocation16 + $0x880] sm:$0xff]  ;;  %v1392_v4 = vld [vmem:[#allocation16 + $0x9b0] sm:$0xff] }
 0x497   :  { %v1323_v16 = vld [vmem:[#allocation16 + $0x788] sm:$0xff]  ;;  %v2808_v21 = vpack.c.bf16 %v1319_v15, %v1314_v14  ;;  %v1368_v14 = vld [vmem:[#allocation16 + $0x8f0] sm:$0xff]  ;;  %v1365_v15 = vld [vmem:[#allocation16 + $0x8d8] sm:$0xff] }
 0x499   :  { %2649 = vmatpush1.bf16.msra.mxu0 %v2648_v23  ;;  %2793 = vmatpush1.bf16.msra.mxu1 %v2792_v24  ;;  %v1327_v23 = vld [vmem:[#allocation16 + $0x7a8] sm:$0xff]  ;;  %v2666_v24 = vpack.c.bf16 %v1328_v17, %v1323_v16  ;;  %v1370_v16 = vld [vmem:[#allocation16 + $0x900] sm:$0xff] }
 0x49a   :  { %2651 = vmatprep.subr.bf16.mxu0 %v2650_v27  ;;  %2795 = vmatprep.subr.bf16.mxu1 %v2794_v28  ;;  %v1329_v27 = vld [vmem:[#allocation16 + $0x7b8] sm:$0xff]  ;;  %v2668_v32 = vpack.c.bf16 %v1327_v23, %v1322_v22  ;;  %v2826_v22 = vpack.c.bf16 %v1370_v16, %v1365_v15  ;;  %v1364_v23 = vld [vmem:[#allocation16 + $0x8d0] sm:$0xff]  ;;  %v1402_v16 = vld [vmem:[#allocation16 + $0xa00] sm:$0xff] }
 0x49b   :  { %v1333_v28 = vld [vmem:[#allocation16 + $0x7d8] sm:$0xff]  ;;  %v2812_v33 = vpack.c.bf16 %v1329_v27, %v1324_v26  ;;  %v1378_v26 = vld [vmem:[#allocation16 + $0x940] sm:$0xff]  ;;  %v1375_v27 = vld [vmem:[#allocation16 + $0x928] sm:$0xff] }
 0x49d   :  { %2653 = vmatpush1.bf16.msra.mxu0 %v2652_v35  ;;  %2797 = vmatpush1.bf16.msra.mxu1 %v2796_v37  ;;  %v1337_v35 = vld [vmem:[#allocation16 + $0x7f8] sm:$0xff]  ;;  %v2670_v37 = vpack.c.bf16 %v1338_v29, %v1333_v28  ;;  %v1380_v28 = vld [vmem:[#allocation16 + $0x950] sm:$0xff] }
 0x49e   :  { %2655 = vmatprep.subr.bf16.mxu0 %v2654_v41  ;;  %2799 = vmatprep.subr.bf16.mxu1 %v2798_v46  ;;  %v1339_v41 = vld [vmem:[#allocation16 + $0x808] sm:$0xff]  ;;  %v2672_v53 = vpack.c.bf16 %v1337_v35, %v1332_v34  ;;  %v2830_v34 = vpack.c.bf16 %v1380_v28, %v1375_v27  ;;  %v1374_v35 = vld [vmem:[#allocation16 + $0x920] sm:$0xff]  ;;  %v1412_v28 = vld [vmem:[#allocation16 + $0xa50] sm:$0xff] }
 0x49f   :  { %v1343_v46 = vld [vmem:[#allocation16 + $0x828] sm:$0xff]  ;;  %v2816_v54 = vpack.c.bf16 %v1339_v41, %v1334_v40  ;;  %v1388_v40 = vld [vmem:[#allocation16 + $0x990] sm:$0xff]  ;;  %v1385_v41 = vld [vmem:[#allocation16 + $0x978] sm:$0xff] }
 0x4a1   :  { %2657 = vmatpush1.bf16.msra.mxu0 %v2656_v57  ;;  %2801 = vmatpush1.bf16.msra.mxu1 %v2800_v58  ;;  %v1347_v57 = vld [vmem:[#allocation16 + $0x848] sm:$0xff]  ;;  %v2674_v58 = vpack.c.bf16 %v1348_v50, %v1343_v46  ;;  %v1390_v46 = vld [vmem:[#allocation16 + $0x9a0] sm:$0xff] }
 0x4a2   :  { %2659 = vmatprep.subr.bf16.mxu0 %v2658_v0  ;;  %2803 = vmatprep.subr.bf16.mxu1 %v2802_v1  ;;  %v1349_v0 = vld [vmem:[#allocation16 + $0x858] sm:$0xff]  ;;  %v2676_v5 = vpack.c.bf16 %v1347_v57, %v1342_v56  ;;  %v2834_v56 = vpack.c.bf16 %v1390_v46, %v1385_v41  ;;  %v1384_v57 = vld [vmem:[#allocation16 + $0x970] sm:$0xff]  ;;  %v1422_v46 = vld [vmem:[#allocation16 + $0xaa0] sm:$0xff] }
 0x4a3   :  { %v1353_v1 = vld [vmem:[#allocation16 + $0x878] sm:$0xff]  ;;  %v2820_v6 = vpack.c.bf16 %v1349_v0, %v1344_v63  ;;  %v1398_v63 = vld [vmem:[#allocation16 + $0x9e0] sm:$0xff]  ;;  %v1395_v0 = vld [vmem:[#allocation16 + $0x9c8] sm:$0xff] }
 0x4a5   :  { %2661 = vmatpush1.bf16.msra.mxu0 %v2660_v8  ;;  %2805 = vmatpush1.bf16.msra.mxu1 %v2804_v9  ;;  %v1357_v8 = vld [vmem:[#allocation16 + $0x898] sm:$0xff]  ;;  %v2678_v9 = vpack.c.bf16 %v1358_v2, %v1353_v1  ;;  %v1400_v1 = vld [vmem:[#allocation16 + $0x9f0] sm:$0xff] }
 0x4a6   :  { %2663 = vmatprep.subr.bf16.mxu0 %v2662_v12  ;;  %2807 = vmatprep.subr.bf16.mxu1 %v2806_v13  ;;  %v1359_v12 = vld [vmem:[#allocation16 + $0x8a8] sm:$0xff]  ;;  %v2680_v17 = vpack.c.bf16 %v1357_v8, %v1352_v7  ;;  %v2838_v7 = vpack.c.bf16 %v1400_v1, %v1395_v0  ;;  %v1394_v8 = vld [vmem:[#allocation16 + $0x9c0] sm:$0xff]  ;;  %v1432_v1 = vld [vmem:[#allocation16 + $0xaf0] sm:$0xff] }
 0x4a7   :  { %v1363_v13 = vld [vmem:[#allocation16 + $0x8c8] sm:$0xff]  ;;  %v2824_v18 = vpack.c.bf16 %v1359_v12, %v1354_v11  ;;  %v1408_v11 = vld [vmem:[#allocation16 + $0xa30] sm:$0xff]  ;;  %v1405_v12 = vld [vmem:[#allocation16 + $0xa18] sm:$0xff] }
 0x4a9   :  { %2665 = vmatpush1.bf16.msra.mxu0 %v2664_v20  ;;  %2809 = vmatpush1.bf16.msra.mxu1 %v2808_v21  ;;  %v1367_v20 = vld [vmem:[#allocation16 + $0x8e8] sm:$0xff]  ;;  %v2682_v21 = vpack.c.bf16 %v1368_v14, %v1363_v13  ;;  %v1410_v13 = vld [vmem:[#allocation16 + $0xa40] sm:$0xff] }
 0x4aa   :  { %2667 = vmatprep.subr.bf16.mxu0 %v2666_v24  ;;  %2811 = vmatprep.subr.bf16.mxu1 %v2810_v25  ;;  %v1369_v24 = vld [vmem:[#allocation16 + $0x8f8] sm:$0xff]  ;;  %v2684_v29 = vpack.c.bf16 %v1367_v20, %v1362_v19  ;;  %v2842_v19 = vpack.c.bf16 %v1410_v13, %v1405_v12  ;;  %v1404_v20 = vld [vmem:[#allocation16 + $0xa10] sm:$0xff] }
 0x4ab   :  { %v1373_v25 = vld [vmem:[#allocation16 + $0x918] sm:$0xff]  ;;  %v2828_v30 = vpack.c.bf16 %v1369_v24, %v1364_v23  ;;  %v1418_v23 = vld [vmem:[#allocation16 + $0xa80] sm:$0xff]  ;;  %v1415_v24 = vld [vmem:[#allocation16 + $0xa68] sm:$0xff] }
 0x4ad   :  { %2669 = vmatpush1.bf16.msra.mxu0 %v2668_v32  ;;  %2813 = vmatpush1.bf16.msra.mxu1 %v2812_v33  ;;  %v1377_v32 = vld [vmem:[#allocation16 + $0x938] sm:$0xff]  ;;  %v2686_v33 = vpack.c.bf16 %v1378_v26, %v1373_v25  ;;  %v1420_v25 = vld [vmem:[#allocation16 + $0xa90] sm:$0xff] }
 0x4ae   :  { %2671 = vmatprep.subr.bf16.mxu0 %v2670_v37  ;;  %2815 = vmatprep.subr.bf16.mxu1 %v2814_v38  ;;  %v1379_v37 = vld [vmem:[#allocation16 + $0x948] sm:$0xff]  ;;  %v2688_v50 = vpack.c.bf16 %v1377_v32, %v1372_v31  ;;  %v2846_v31 = vpack.c.bf16 %v1420_v25, %v1415_v24  ;;  %v1414_v32 = vld [vmem:[#allocation16 + $0xa60] sm:$0xff]  ;;  %v1096_v24 = vld [vmem:[#allocation16 + $0x70] sm:$0xff] }
 0x4af   :  { %v1383_v38 = vld [vmem:[#allocation16 + $0x968] sm:$0xff]  ;;  %v2832_v51 = vpack.c.bf16 %v1379_v37, %v1374_v35  ;;  %v1428_v35 = vld [vmem:[#allocation16 + $0xad0] sm:$0xff]  ;;  %v1425_v37 = vld [vmem:[#allocation16 + $0xab8] sm:$0xff] }
 0x4b1   :  { %2673 = vmatpush1.bf16.msra.mxu0 %v2672_v53  ;;  %2817 = vmatpush1.bf16.msra.mxu1 %v2816_v54  ;;  %v1387_v53 = vld [vmem:[#allocation16 + $0x988] sm:$0xff]  ;;  %v2690_v54 = vpack.c.bf16 %v1388_v40, %v1383_v38  ;;  %v1430_v38 = vld [vmem:[#allocation16 + $0xae0] sm:$0xff] }
 0x4b2   :  { %2675 = vmatprep.subr.bf16.mxu0 %v2674_v58  ;;  %2819 = vmatprep.subr.bf16.mxu1 %v2818_v59  ;;  %v1389_v58 = vld [vmem:[#allocation16 + $0x998] sm:$0xff]  ;;  %v2692_v2 = vpack.c.bf16 %v1387_v53, %v1382_v52  ;;  %v2850_v52 = vpack.c.bf16 %v1430_v38, %v1425_v37  ;;  %v1424_v53 = vld [vmem:[#allocation16 + $0xab0] sm:$0xff] }
 0x4b3   :  { %v1393_v59 = vld [vmem:[#allocation16 + $0x9b8] sm:$0xff]  ;;  %v2836_v3 = vpack.c.bf16 %v1389_v58, %v1384_v57  ;;  %v1438_v57 = vld [vmem:[#allocation16 + $0xb20] sm:$0xff]  ;;  %v1435_v58 = vld [vmem:[#allocation16 + $0xb08] sm:$0xff] }
 0x4b5   :  { %2677 = vmatpush1.bf16.msra.mxu0 %v2676_v5  ;;  %2821 = vmatpush1.bf16.msra.mxu1 %v2820_v6  ;;  %v1397_v5 = vld [vmem:[#allocation16 + $0x9d8] sm:$0xff]  ;;  %v2694_v6 = vpack.c.bf16 %v1398_v63, %v1393_v59  ;;  %v1440_v59 = vld [vmem:[#allocation16 + $0xb30] sm:$0xff] }
 0x4b6   :  { %2679 = vmatprep.subr.bf16.mxu0 %v2678_v9  ;;  %2823 = vmatprep.subr.bf16.mxu1 %v2822_v10  ;;  %v1399_v9 = vld [vmem:[#allocation16 + $0x9e8] sm:$0xff]  ;;  %v2696_v14 = vpack.c.bf16 %v1397_v5, %v1392_v4  ;;  %v2854_v4 = vpack.c.bf16 %v1440_v59, %v1435_v58  ;;  %v1434_v5 = vld [vmem:[#allocation16 + $0xb00] sm:$0xff] }
 0x4b7   :  { %v1403_v10 = vld [vmem:[#allocation16 + $0xa08] sm:$0xff]  ;;  %v2840_v15 = vpack.c.bf16 %v1399_v9, %v1394_v8  ;;  %v1326_v9 = vld [vmem:[#allocation16 + $0x7a0] sm:$0xff] }
 0x4b8   :  { %v1171_v8 = vld [vmem:[#allocation16 + $0x2c8] sm:$0xff] }
 0x4b9   :  { %2681 = vmatpush1.bf16.msra.mxu0 %v2680_v17  ;;  %2825 = vmatpush1.bf16.msra.mxu1 %v2824_v18  ;;  %v1407_v17 = vld [vmem:[#allocation16 + $0xa28] sm:$0xff]  ;;  %v2698_v18 = vpack.c.bf16 %v1408_v11, %v1403_v10 }
 0x4ba   :  { %2683 = vmatprep.subr.bf16.mxu0 %v2682_v21  ;;  %2827 = vmatprep.subr.bf16.mxu1 %v2826_v22  ;;  %v1409_v21 = vld [vmem:[#allocation16 + $0xa38] sm:$0xff]  ;;  %v2700_v26 = vpack.c.bf16 %v1407_v17, %v1402_v16  ;;  %v1331_v10 = vld [vmem:[#allocation16 + $0x7c8] sm:$0xff]  ;;  %v1246_v17 = vld [vmem:[#allocation16 + $0x520] sm:$0xff] }
 0x4bb   :  { %v1413_v22 = vld [vmem:[#allocation16 + $0xa58] sm:$0xff]  ;;  %v2844_v27 = vpack.c.bf16 %v1409_v21, %v1404_v20  ;;  %v1091_v16 = vld [vmem:[#allocation16 + $0x48] sm:$0xff]  ;;  %v1336_v21 = vld [vmem:[#allocation16 + $0x7f0] sm:$0xff] }
 0x4bc   :  { %v1181_v20 = vld [vmem:[#allocation16 + $0x318] sm:$0xff] }
 0x4bd   :  { %2685 = vmatpush1.bf16.msra.mxu0 %v2684_v29  ;;  %2829 = vmatpush1.bf16.msra.mxu1 %v2828_v30  ;;  %v1417_v29 = vld [vmem:[#allocation16 + $0xa78] sm:$0xff]  ;;  %v2702_v30 = vpack.c.bf16 %v1418_v23, %v1413_v22 }
 0x4be   :  { %2687 = vmatprep.subr.bf16.mxu0 %v2686_v33  ;;  %2831 = vmatprep.subr.bf16.mxu1 %v2830_v34  ;;  %v1419_v33 = vld [vmem:[#allocation16 + $0xa88] sm:$0xff]  ;;  %v2704_v40 = vpack.c.bf16 %v1417_v29, %v1412_v28  ;;  %v1341_v22 = vld [vmem:[#allocation16 + $0x818] sm:$0xff]  ;;  %v3757_v29 = vld [vmem:[#allocation2 + $0x10] sm:$0xf] }
 0x4bf   :  { %v1423_v34 = vld [vmem:[#allocation16 + $0xaa8] sm:$0xff]  ;;  %v2848_v41 = vpack.c.bf16 %v1419_v33, %v1414_v32  ;;  %v1261_v28 = vld [vmem:[#allocation16 + $0x598] sm:$0xff]  ;;  %v1186_v32 = vld [vmem:[#allocation16 + $0x340] sm:$0xff] }
 0x4c0   :  { %v1191_v33 = vld [vmem:[#allocation16 + $0x368] sm:$0xff] }
 0x4c1   :  { %2689 = vmatpush1.bf16.msra.mxu0 %v2688_v50  ;;  %2833 = vmatpush1.bf16.msra.mxu1 %v2832_v51  ;;  %v1427_v50 = vld [vmem:[#allocation16 + $0xac8] sm:$0xff]  ;;  %v2706_v51 = vpack.c.bf16 %v1428_v35, %v1423_v34  ;;  %v1346_v34 = vld [vmem:[#allocation16 + $0x840] sm:$0xff] }
 0x4c2   :  { %2691 = vmatprep.subr.bf16.mxu0 %v2690_v54  ;;  %2835 = vmatprep.subr.bf16.mxu1 %v2834_v56  ;;  %v1429_v54 = vld [vmem:[#allocation16 + $0xad8] sm:$0xff]  ;;  %v2708_v63 = vpack.c.bf16 %v1427_v50, %v1422_v46  ;;  %v1351_v35 = vld [vmem:[#allocation16 + $0x868] sm:$0xff]  ;;  %v1266_v50 = vld [vmem:[#allocation16 + $0x5c0] sm:$0xff] }
 0x4c3   :  { %v1433_v56 = vld [vmem:[#allocation16 + $0xaf8] sm:$0xff]  ;;  %v2852_v0 = vpack.c.bf16 %v1429_v54, %v1424_v53  ;;  %v1111_v46 = vld [vmem:[#allocation16 + $0xe8] sm:$0xff]  ;;  %v1196_v53 = vld [vmem:[#allocation16 + $0x390] sm:$0xff] }
 0x4c4   :  { %v1201_v54 = vld [vmem:[#allocation16 + $0x3b8] sm:$0xff] }
 0x4c5   :  { %2693 = vmatpush1.bf16.msra.mxu0 %v2692_v2  ;;  %2837 = vmatpush1.bf16.msra.mxu1 %v2836_v3  ;;  %v1437_v2 = vld [vmem:[#allocation16 + $0xb18] sm:$0xff]  ;;  %v2710_v3 = vpack.c.bf16 %v1438_v57, %v1433_v56  ;;  %v1356_v56 = vld [vmem:[#allocation16 + $0x890] sm:$0xff]  ;;  %v2870_v59 = vpack.c.bf16 %v1201_v54, %v1196_v53 }
 0x4c6   :  { %2695 = vmatprep.subr.bf16.mxu0 %v2694_v6  ;;  %2839 = vmatprep.subr.bf16.mxu1 %v2838_v7  ;;  %v1439_v6 = vld [vmem:[#allocation16 + $0xb28] sm:$0xff]  ;;  %v1166_v7 = vld [vmem:[#allocation16 + $0x2a0] sm:$0xff]  ;;  %v2712_v11 = vpack.c.bf16 %v1437_v2, %v1432_v1  ;;  %v1361_v57 = vld [vmem:[#allocation16 + $0x8b8] sm:$0xff] }
 0x4c7   :  { %v2856_v12 = vpack.c.bf16 %v1439_v6, %v1434_v5  ;;  %v2858_v13 = vpack.c.bf16 %v1171_v8, %v1166_v7  ;;  %v2902_v1 = vpack.c.bf16 %v1361_v57, %v1356_v56  ;;  %v1281_v2 = vld [vmem:[#allocation16 + $0x638] sm:$0xff]  ;;  %v1366_v5 = vld [vmem:[#allocation16 + $0x8e0] sm:$0xff]  ;;  %v1371_v6 = vld [vmem:[#allocation16 + $0x908] sm:$0xff] }
 0x4c8   :  { %v1156_v57 = vld [vmem:[#allocation16 + $0x250] sm:$0xff] }
 0x4c9   :  { %2697 = vmatpush1.bf16.msra.mxu0 %v2696_v14  ;;  %2841 = vmatpush1.bf16.msra.mxu1 %v2840_v15  ;;  %v2890_v14 = vpack.c.bf16 %v1331_v10, %v1326_v9  ;;  %v1086_v15 = vld [vmem:[#allocation16 + $0x20] sm:$0xff] }
 0x4ca   :  { %2699 = vmatprep.subr.bf16.mxu0 %v2698_v18  ;;  %2843 = vmatprep.subr.bf16.mxu1 %v2842_v19  ;;  %v1251_v18 = vld [vmem:[#allocation16 + $0x548] sm:$0xff]  ;;  %v1176_v19 = vld [vmem:[#allocation16 + $0x2f0] sm:$0xff]  ;;  %v2860_v23 = vpack.c.bf16 %v1091_v16, %v1086_v15  ;;  %v1126_v10 = vld [vmem:[#allocation16 + $0x160] sm:$0xff] }
 0x4cb   :  { %v2892_v25 = vpack.c.bf16 %v1251_v18, %v1246_v17  ;;  %v1216_v15 = vld [vmem:[#allocation16 + $0x430] sm:$0xff]  ;;  %v1221_v16 = vld [vmem:[#allocation16 + $0x458] sm:$0xff] }
 0x4cc   :  { %1614 = vmatmul.mubr.f32.vlgmr.msra.gmra.mrb[6].mxu0 %v3741_v42  ;;  %1827 = vmatmul.mubr.f32.vlgmr.msra.gmra.mrb[12].mxu1 %v3741_v42  ;;  %v1376_v17 = vld [vmem:[#allocation16 + $0x930] sm:$0xff]  ;;  %v1381_v18 = vld [vmem:[#allocation16 + $0x958] sm:$0xff] }
 0x4cd   :  { %2701 = vmatpush1.bf16.msra.mxu0 %v2700_v26  ;;  %2845 = vmatpush1.bf16.msra.mxu1 %v2844_v27  ;;  %v1101_v26 = vld [vmem:[#allocation16 + $0x98] sm:$0xff]  ;;  %v1256_v27 = vld [vmem:[#allocation16 + $0x570] sm:$0xff] }
 0x4ce   :  { %2703 = vmatprep.subr.bf16.mxu0 %v2702_v30  ;;  %2847 = vmatprep.subr.bf16.mxu1 %v2846_v31  ;;  %v2862_v30 = vpack.c.bf16 %v1181_v20, %v1176_v19  ;;  %v2894_v31 = vpack.c.bf16 %v1341_v22, %v1336_v21  ;;  %v2864_v37 = vpack.c.bf16 %v1101_v26, %v1096_v24  ;;  %v1136_v22 = vld [vmem:[#allocation16 + $0x1b0] sm:$0xff]  ;;  %v1301_v26 = vld [vmem:[#allocation16 + $0x6d8] sm:$0xff] }
 0x4cf   :  { %1684 = vmatprep.mubr.f32.mxu0 %v3237_v55  ;;  %1897 = vmatprep.mubr.f32.mxu1 %v3237_v55  ;;  %v2896_v38 = vpack.c.bf16 %v1261_v28, %v1256_v27  ;;  %v2878_v21 = vpack.c.bf16 %v1221_v16, %v1216_v15  ;;  %v1296_v24 = vld [vmem:[#allocation16 + $0x6b0] sm:$0xff]  ;;  %v1226_v27 = vld [vmem:[#allocation16 + $0x480] sm:$0xff]  ;;  %v1231_v28 = vld [vmem:[#allocation16 + $0x4a8] sm:$0xff] }
 0x4d1   :  { %2705 = vmatpush1.bf16.msra.mxu0 %v2704_v40  ;;  %2849 = vmatpush1.bf16.msra.mxu1 %v2848_v41  ;;  %v2866_v40 = vpack.c.bf16 %v1191_v33, %v1186_v32  ;;  %v1106_v41 = vld [vmem:[#allocation16 + $0xc0] sm:$0xff]  ;;  %v2912_v33 = vpack.c.bf16 %v1301_v26, %v1296_v24 }
 0x4d2   :  { %2707 = vmatprep.subr.bf16.mxu0 %v2706_v51  ;;  %2851 = vmatprep.subr.bf16.mxu1 %v2850_v52  ;;  %v2898_v51 = vpack.c.bf16 %v1351_v35, %v1346_v34  ;;  %v1271_v52 = vld [vmem:[#allocation16 + $0x5e8] sm:$0xff]  ;;  %v2868_v58 = vpack.c.bf16 %v1111_v46, %v1106_v41  ;;  %v2882_v34 = vpack.c.bf16 %v1231_v28, %v1226_v27  ;;  %v1146_v35 = vld [vmem:[#allocation16 + $0x200] sm:$0xff]  ;;  %v1236_v46 = vld [vmem:[#allocation16 + $0x4d0] sm:$0xff] }
 0x4d3   :  { %v1311_v41 = vld [vmem:[#allocation16 + $0x728] sm:$0xff] }
 0x4d5   :  { %2709 = vmatpush1.bf16.msra.mxu0 %v2708_v63  ;;  %2853 = vmatpush1.bf16.msra.mxu1 %v2852_v0  ;;  %v1121_v63 = vld [vmem:[#allocation16 + $0x138] sm:$0xff]  ;;  %v1276_v0 = vld [vmem:[#allocation16 + $0x610] sm:$0xff] }
 0x4d6   :  { %2711 = vmatprep.subr.bf16.mxu0 %v2710_v3  ;;  %2855 = vmatprep.subr.bf16.mxu1 %v2854_v4  ;;  %v1206_v3 = vld [vmem:[#allocation16 + $0x3e0] sm:$0xff]  ;;  %v1211_v4 = vld [vmem:[#allocation16 + $0x408] sm:$0xff]  ;;  %v2904_v8 = vpack.c.bf16 %v1281_v2, %v1276_v0 }
 0x4d7   :  { %v2874_v9 = vpack.c.bf16 %v1211_v4, %v1206_v3  ;;  %v1411_v2 = vld [vmem:[#allocation16 + $0xa48] sm:$0xff]  ;;  %v1416_v4 = vld [vmem:[#allocation16 + $0xa70] sm:$0xff] }
 0x4d9   :  { %2713 = vmatpush1.bf16.msra.mxu0 %v2712_v11  ;;  %2857 = vmatpush1.bf16.msra.mxu1 %v2856_v12  ;;  %v1131_v11 = vld [vmem:[#allocation16 + $0x188] sm:$0xff]  ;;  %v1286_v12 = vld [vmem:[#allocation16 + $0x660] sm:$0xff] }
 0x4da   :  { %2859 = vmatprep.subr.bf16.mxu0 %v2858_v13  ;;  %2891 = vmatprep.subr.bf16.mxu1 %v2890_v14  ;;  %v2906_v13 = vpack.c.bf16 %v1371_v6, %v1366_v5  ;;  %v1291_v14 = vld [vmem:[#allocation16 + $0x688] sm:$0xff]  ;;  %v2876_v19 = vpack.c.bf16 %v1131_v11, %v1126_v10  ;;  %v1421_v5 = vld [vmem:[#allocation16 + $0xa98] sm:$0xff]  ;;  %v1436_v10 = vld [vmem:[#allocation16 + $0xb10] sm:$0xff] }
 0x4db   :  { %v2908_v20 = vpack.c.bf16 %v1291_v14, %v1286_v12  ;;  %v2926_v6 = vpack.c.bf16 %v1421_v5, %v1416_v4  ;;  %v1441_v11 = vld [vmem:[#allocation16 + $0xb38] sm:$0xff] }
 0x4dc   :  { %2206 = vmatmul.mubr.msk.f32.vlgmr.msra.gmra.mrb[6].mxu0 %vm278_vm2, %v3757_v29  ;;  %2207 = vmatmul.mubr.msk.f32.vlgmr.msra.gmra.mrb[12].mxu1 %vm278_vm2, %v3757_v29  ;;  %v2932_v12 = vpack.c.bf16 %v1441_v11, %v1436_v10  ;;  %v2165_v11 = vand.u32 127, %v254_v45 }
 0x4dd   :  { %2861 = vmatpush3.bf16.msra.mxu0 %v2860_v23  ;;  %1968 = vmatprep.mubr.f32.mxu0 %v3739_v39  ;;  %v2900_v39 = vpack.c.bf16 %v1271_v52, %v1266_v50  ;;  %v1141_v23 = vld [vmem:[#allocation16 + $0x1d8] sm:$0xff] }
 0x4de   :  { %2893 = vmatpush3.bf16.msra.mxu1 %v2892_v25  ;;  %2038 = vmatprep.mubr.f32.mxu1 %v3749_v61  ;;  %v1116_v61 = vld [vmem:[#allocation16 + $0x110] sm:$0xff]  ;;  %v2910_v25 = vpack.c.bf16 %v1381_v18, %v1376_v17  ;;  %v2880_v32 = vpack.c.bf16 %v1141_v23, %v1136_v22  ;;  %v1241_v50 = vld [vmem:[#allocation16 + $0x4f8] sm:$0xff]  ;;  %vm2168_vm8 = vcmp.eq.s32.totalorder %v2165_v11, 2  ;;  %vm2167_vm9 = vcmp.eq.s32.totalorder %v2165_v11, 1 }
 0x4df   :  { %2863 = vmatprep.subr.bf16.mxu0 %v2862_v30  ;;  %2895 = vmatprep.subr.bf16.mxu1 %v2894_v31  ;;  %v2872_v7 = vpack.c.bf16 %v1121_v63, %v1116_v61  ;;  %v1386_v30 = vld [vmem:[#allocation16 + $0x980] sm:$0xff]  ;;  %v1391_v31 = vld [vmem:[#allocation16 + $0x9a8] sm:$0xff]  ;;  %v1401_v52 = vld [vmem:[#allocation16 + $0x9f8] sm:$0xff]  ;;  %v2886_v56 = vpack.c.bf16 %v1241_v50, %v1236_v46  ;;  %vm2166_vm10 = vcmp.eq.s32.totalorder %v2165_v11, 0 }
 0x4e0   :  { %v1321_v61 = vld [vmem:[#allocation16 + $0x778] sm:$0xff] }
 0x4e1   :  { %2865 = vmatpush3.bf16.msra.mxu0 %v2864_v37  ;;  %v1151_v37 = vld [vmem:[#allocation16 + $0x228] sm:$0xff] }
 0x4e2   :  { %2897 = vmatpush3.bf16.msra.mxu1 %v2896_v38  ;;  %2867 = vmatprep.subr.bf16.mxu0 %v2866_v40  ;;  %v1306_v38 = vld [vmem:[#allocation16 + $0x700] sm:$0xff]  ;;  %v2914_v40 = vpack.c.bf16 %v1391_v31, %v1386_v30  ;;  %v2884_v53 = vpack.c.bf16 %v1151_v37, %v1146_v35 }
 0x4e3   :  { %2899 = vmatprep.subr.bf16.mxu1 %v2898_v51  ;;  %v1396_v51 = vld [vmem:[#allocation16 + $0x9d0] sm:$0xff]  ;;  %v2916_v54 = vpack.c.bf16 %v1311_v41, %v1306_v38 }
 0x4e5   :  { %2869 = vmatpush3.bf16.msra.mxu0 %v2868_v58  ;;  %v1161_v58 = vld [vmem:[#allocation16 + $0x278] sm:$0xff] }
 0x4e6   :  { %2901 = vmatpush3.bf16.msra.mxu1 %v2900_v39  ;;  %2871 = vmatprep.subr.bf16.mxu0 %v2870_v59  ;;  %v2918_v39 = vpack.c.bf16 %v1401_v52, %v1396_v51  ;;  %v1316_v59 = vld [vmem:[#allocation16 + $0x750] sm:$0xff]  ;;  %v2888_v63 = vpack.c.bf16 %v1161_v58, %v1156_v57 }
 0x4e7   :  { %2903 = vmatprep.subr.bf16.mxu1 %v2902_v1  ;;  %v2920_v0 = vpack.c.bf16 %v1321_v61, %v1316_v59  ;;  %v1406_v1 = vld [vmem:[#allocation16 + $0xa20] sm:$0xff] }
 0x4e8   :  { %v2923_v3 = vpack.c.bf16 %v1411_v2, %v1406_v1 }
 0x4e9   :  { %2873 = vmatpush3.bf16.msra.mxu0 %v2872_v7  ;;  %v1426_v7 = vld [vmem:[#allocation16 + $0xac0] sm:$0xff] }
 0x4ea   :  { %2905 = vmatpush3.bf16.msra.mxu1 %v2904_v8  ;;  %2875 = vmatprep.subr.bf16.mxu0 %v2874_v9  ;;  %v1431_v8 = vld [vmem:[#allocation16 + $0xae8] sm:$0xff] }
 0x4eb   :  { %2907 = vmatprep.subr.bf16.mxu1 %v2906_v13  ;;  %v2929_v9 = vpack.c.bf16 %v1431_v8, %v1426_v7 }
 0x4ed   :  { %2877 = vmatpush3.bf16.msra.mxu0 %v2876_v19 }
 0x4ee   :  { %2909 = vmatpush3.bf16.msra.mxu1 %v2908_v20  ;;  %2879 = vmatprep.subr.bf16.mxu0 %v2878_v21 }
 0x4ef   :  { %2911 = vmatprep.subr.bf16.mxu1 %v2910_v25 }
 0x4f1   :  { %2881 = vmatpush3.bf16.msra.mxu0 %v2880_v32 }
 0x4f2   :  { %2913 = vmatpush3.bf16.msra.mxu1 %v2912_v33  ;;  %2883 = vmatprep.subr.bf16.mxu0 %v2882_v34 }
 0x4f3   :  { %2915 = vmatprep.subr.bf16.mxu1 %v2914_v40 }
 0x4f5   :  { %2885 = vmatpush3.bf16.msra.mxu0 %v2884_v53 }
 0x4f6   :  { %2917 = vmatpush3.bf16.msra.mxu1 %v2916_v54  ;;  %2887 = vmatprep.subr.bf16.mxu0 %v2886_v56 }
 0x4f7   :  { %2919 = vmatprep.subr.bf16.mxu1 %v2918_v39 }
 0x4f9   :  { %2889 = vmatpush3.bf16.msra.mxu0 %v2888_v63 }
 0x4fa   :  { %2921 = vmatpush3.bf16.msra.mxu1 %v2920_v0  ;;  %2922 = vmatprep.subr.bf16.mxu0 %v3235_v49 }
 0x4fc   :  { %1969 = vmatmul.mubr.f32.vlgmr.msra.gmra.mrb[8].mxu0 %v3735_v36  ;;  %v1442_v36 = vld [vmem:[#allocation17] sm:$0x1f] }
 0x4fd   :  { %2039 = vmatmul.mubr.f32.vlgmr.msra.gmra.mrb[14].mxu1 %v3741_v42  ;;  %2924 = vmatpush3.bf16.msra.mxu0 %v2923_v3  ;;  %v1447_v42 = vrot.slane %v1442_v36, %v771_v43  ;;  %v1451_v13 = vrot.slane %v1442_v36, %v775_v47  ;;  %v1459_v14 = vrot.slane %v1442_v36, %v783_v48 }
 0x4fe   :  { %2925 = vmatprep.subr.bf16.mxu0 %v3235_v49  ;;  %2457 = vmatprep.mubr.msk.f32.mxu0 %vm3236_vm1, %v3237_v55  ;;  %v1455_v55 = vrot.slane %v1442_v36, %v779_v44  ;;  %v1463_v51 = vrot.slane %v1442_v36, %v787_v62 }
 0x501   :  { %2927 = vmatpush3.bf16.msra.mxu0 %v2926_v6 }
 0x502   :  { %2928 = vmatprep.subr.bf16.mxu0 %v3235_v49 }
 0x505   :  { %2930 = vmatpush3.bf16.msra.mxu0 %v2929_v9 }
 0x506   :  { %2931 = vmatprep.subr.bf16.mxu0 %v3235_v49 }
 0x509   :  { %2933 = vmatpush3.bf16.msra.mxu0 %v2932_v12 }
 0x50c   :  { %2458 = vmatmul.mubr.msk.f32.vlgmr.msra.gmra.mrb[10].mxu0 %vm278_vm2, %v3757_v29 }
 0x5af   :  { %v1686_v15 = vpop.f32.mrb[6].mxu0  ;;  %v1899_v16 = vpop.f32.mrb[12].mxu1 }
 0x5b0   :  { %v2934_v49 = vadd.f32 %v1686_v15, %v1447_v42  ;;  %v2936_v17 = vadd.f32 %v1899_v16, %v1455_v55  ;;  %v1688_v18 = vpop.f32.mrb[7].mxu0  ;;  %v1901_v19 = vpop.f32.mrb[13].mxu1  ;;  %v2174_v55 = vstv %s1056_s24 }
 0x5b1   :  { %v2935_v29 = vadd.f32 %v1688_v18, %v1451_v13  ;;  %v2937_v20 = vadd.f32 %v1901_v19, %v1459_v14 }
 0x5b2   :  { %v2114_v21 = vmax.f32 %v2934_v49, 0.0  ;;  %v2116_v22 = vmax.f32 %v2936_v17, 0.0 }
 0x5b3   :  { %v2115_v43 = vmax.f32 %v2935_v29, 0.0  ;;  %v2117_v23 = vmax.f32 %v2937_v20, 0.0 }
 0x5b4   :  { %v2124_v24 = vrot.slane %v2114_v21, 2  ;;  %v2126_v44 = vrot.slane %v2116_v22, 2 }
 0x5b5   :  { %v2125_v25 = vrot.slane %v2115_v43, 2  ;;  %v2127_v26 = vrot.slane %v2117_v23, 2 }
 0x5b6   :  { %v2134_v47 = vsub.f32 %v2114_v21, %v2124_v24  ;;  %v2136_v27 = vsub.f32 %v2116_v22, %v2126_v44 }
 0x5b7   :  { %v2135_v48 = vsub.f32 %v2115_v43, %v2125_v25  ;;  %v2137_v28 = vsub.f32 %v2117_v23, %v2127_v26 }
 0x5b8   :  { %v2139_v30 = vmul.f32 %v2134_v47, %v2134_v47  ;;  %v2141_v31 = vmul.f32 %v2136_v27, %v2136_v27 }
 0x5b9   :  { %v2140_v32 = vmul.f32 %v2135_v48, %v2135_v48  ;;  %v2142_v35 = vmul.f32 %v2137_v28, %v2137_v28 }
 0x5ba   :  { %v2145_v33 = vsel %vm2144_vm7, %v2139_v30, 0.0  ;;  %v2148_v38 = vsel %vm2144_vm7, %v2141_v31, 0.0 }
 0x5bb   :  { %v2146_v34 = vsel %vm2144_vm7, %v2140_v32, 0.0  ;;  %v2150_v41 = vsel %vm2144_vm7, %v2142_v35, 0.0 }
 0x5bc   :  { %v2147_v37 = vadd.f32 %v2146_v34, %v2145_v33 }
 0x5be   :  { %v2149_v40 = vadd.f32 %v2148_v38, %v2147_v37 }
 0x5c0   :  { %v2151_v46 = vadd.f32 %v2150_v41, %v2149_v40 }
 0x5cf   :  { %v2337_v50 = vpop.f32.mrb[8].mxu0 }
 0x5d0   :  { %v2372_v52 = vpop.f32.mrb[14].mxu1  ;;  %v2338_v53 = vpop.f32.mrb[9].mxu0 }
 0x5d1   :  { %v2339_v54 = vadd.f32 %v2338_v53, %v2337_v50  ;;  %v2373_v56 = vpop.f32.mrb[15].mxu1 }
 0x5d2   :  { %v2374_v57 = vadd.f32 %v2373_v56, %v2372_v52 }
 0x5d3   :  { %v1971_v58 = vadd.f32 %v2339_v54, %v1463_v51 }
 0x5d5   :  { %v2041_v39 = vadd.f32 %v2374_v57, %v1971_v58 }
 0x5df   :  { %v2110_v59 = vpop.f32.mrb[10].mxu0 }
 0x5e0   :  { %v2111_v61 = vadd.f32 %v2110_v59, %v2041_v39  ;;  %v2459_v63 = vpop.f32.mrb[11].mxu0 }
 0x5e2   :  { %v2118_v0 = vmax.f32 %v2111_v61, 0.0 }
 0x5e4   :  { %v2128_v1 = vrot.slane %v2118_v0, 2 }
 0x5e6   :  { %v2138_v2 = vsub.f32 %v2118_v0, %v2128_v1 }
 0x5e8   :  { %v2143_v3 = vmul.f32 %v2138_v2, %v2138_v2 }
 0x5ea   :  { %v2152_v4 = vsel %vm1060_vm0, %v2143_v3, 0.0 }
 0x5eb   :  { %v2153_v5 = vadd.f32 %v2152_v4, %v2151_v46 }
 0x5ed   :  { %2154 = vadd.xlane.f32.xlu0 %v2153_v5 }
 0x67a   :  { %v2155_v60 = vpop.xlane.xlu0 %2154 }
 0x67b   :  { %v2156_v62 = vrot.slane %v2155_v60, 4 }
 0x67d   :  { %v2157_v6 = vadd.f32 %v2156_v62, %v2155_v60 }
 0x67f   :  { %v2158_v7 = vrot.slane %v2157_v6, 2 }
 0x681   :  { %v2159_v8 = vadd.f32 %v2158_v7, %v2157_v6 }
 0x683   :  { %v2160_v9 = vrot.slane %v2159_v8, 1 }
 0x685   :  { %v2161_v10 = vadd.f32 %v2160_v9, %v2159_v8 }
 0x687   :  { %2948 = vpush %v2161_v10 }
 0x6b8   :  { %s2949_s27 = spop %2948 }
 0x6b9   :  { %s2163_s28 = smul.f32 0.5, %s2949_s27 }
 0x6bb   :  { %s2169_s6 = sadd.f32 %s2163_s28, %s1056_s24  ;;  %v2172_v42 = vstv %s2163_s28 }
 0x6bd   :  { %v2170_v12 = vstv %s2169_s6 }
 0x6be   :  { %v2171_v36 = vsel %vm2168_vm8, %v2170_v12, 0.0 }
 0x6bf   :  { %v2173_v13 = vsel %vm2167_vm9, %v2172_v42, %v2171_v36 }
 0x6c0   :  { %v2175_v14 = vsel %vm2166_vm10, %v2174_v55, %v2173_v13 }
 0x6c1   :  { %2176 = vst [vmem:[%s3804_s14] sm:$0x1] %v2175_v14 }
 0x6c2   :  { %2181 = vsyncpa [#allocation4], 1 }
 0x6c3   :  { %2182 = vsyncpa [#allocation6], 1 }
 0x6c4   :  { %2183 = vsyncpa [#allocation9], 1 }
 0x6c5   :  { %2184 = vsyncpa [#allocation12], 1 }
 0x6c6   :  { %2185 = vsyncpa [#allocation15], 1 }
 0x6c7   :  { %2186 = vsyncpa [#allocation18], 1 }

</bundles_post_ra>
